<compile_context>
chip_gen: v5e
topology: v5e:2x2
jax: 0.10.0
libtpu: 0.0.40
codegen_flags: <defaults>
</compile_context>

<pallas_src>
import functools

import jax
import jax.numpy as jnp
from jax.experimental import pallas as pl
from jax.experimental.pallas import tpu as pltpu

_F32 = jnp.float32
_BF16 = jnp.bfloat16
_VMEM_LIMIT = 32 * 1024 * 1024        # within scoped-VMEM defaults on v5e/v6e/v7x


def _round_up(x, m):
    return (x + m - 1) // m * m


def _silu(x):
    return x * jax.nn.sigmoid(x)


def _leaky(x):
    return jnp.where(x >= 0.0, x, 0.1 * x)


def fold_bn(w, bn, eps=1e-5):
    """Fold BatchNorm into the preceding (bias-free) conv weight."""
    scale = bn["gamma"] / jnp.sqrt(bn["var"] + eps)
    return w * scale, bn["beta"] - bn["mean"] * scale


# ----------------------------------------------------------------------------
# Kernel 1: fused multi-input linear  act(sum_i A_i @ W_i + b)
# ----------------------------------------------------------------------------
def _linear_kernel(*refs, n_in, act):
    a_refs = refs[:n_in]
    w_refs = refs[n_in:2 * n_in]
    b_ref = refs[2 * n_in]
    o_ref = refs[2 * n_in + 1]
    acc = jnp.dot(a_refs[0][...], w_refs[0][...], preferred_element_type=jnp.float32)
    for i in range(1, n_in):
        acc = acc + jnp.dot(a_refs[i][...], w_refs[i][...],
                            preferred_element_type=jnp.float32)
    acc = acc + b_ref[...]
    if act == "silu":
        acc = _silu(acc)
    elif act == "leaky":
        acc = _leaky(acc)
    o_ref[...] = acc.astype(o_ref.dtype)


def pallas_linear(a_list, w_list, bias=None, act="none", out_dtype=_BF16):
    """act(sum_i a_i @ w_i + bias); a_i: (M, K_i).  bf16 operands, f32 accumulation."""
    n_in = len(a_list)
    M = a_list[0].shape[0]
    N = w_list[0].shape[1]
    if bias is None:
        bias = jnp.zeros((N,), _F32)
    bias = jnp.asarray(bias).reshape(1, N).astype(_F32)

    # Fixed row tile with a padded last tile; never fall back to tm = M for large M.
    tm = min(512, _round_up(M, 8))
    Mp = _round_up(M, tm)
    a_list = [a.astype(_BF16) for a in a_list]
    if Mp != M:
        a_list = [jnp.pad(a, ((0, Mp - M), (0, 0))) for a in a_list]
    w_list = [w.astype(_BF16) for w in w_list]

    in_specs = ([pl.BlockSpec((tm, a.shape[1]), lambda i: (i, 0)) for a in a_list]
                + [pl.BlockSpec((w.shape[0], N), lambda i: (0, 0)) for w in w_list]
                + [pl.BlockSpec((1, N), lambda i: (0, 0))])
    out = pl.pallas_call(
        functools.partial(_linear_kernel, n_in=n_in, act=act),
        out_shape=jax.ShapeDtypeStruct((Mp, N), out_dtype),
        grid=(Mp // tm,),
        in_specs=in_specs,
        out_specs=pl.BlockSpec((tm, N), lambda i: (i, 0)),
        compiler_params=pltpu.CompilerParams(
            dimension_semantics=("parallel",), vmem_limit_bytes=_VMEM_LIMIT),
    )(*a_list, *w_list, bias)
    return out[:M] if Mp != M else out


# ----------------------------------------------------------------------------
# Kernel 2: Bottleneck = Conv1x1+BN+SiLU -> Conv3x3(same)+BN+SiLU, fully fused.
# The 3x3 is computed as 9 masked shifted matmuls on a VMEM-resident flattened
# image tile (no im2col materialization in HBM).
# ----------------------------------------------------------------------------
def _bottleneck_kernel(x_ref, w1_ref, b1_ref, w2_ref, b2_ref, o_ref, t_ref, *, H, W):
    HW = H * W
    # fused 1x1 conv + BN + SiLU over the whole (padded, flattened) pixel block
    t = jnp.dot(x_ref[0], w1_ref[...], preferred_element_type=jnp.float32) + b1_ref[...]
    t_ref[...] = _silu(t).astype(t_ref.dtype)

    row = jax.lax.broadcasted_iota(jnp.int32, (HW, 1), 0)
    hh = row // W
    ww = row - hh * W
    acc = jnp.zeros((HW, o_ref.shape[-1]), jnp.float32)
    for dh in range(-1, 2):
        hv = jnp.logical_and(hh + dh >= 0, hh + dh < H)
        for dw in range(-1, 2):
            wv = jnp.logical_and(ww + dw >= 0, ww + dw < W)
            off = (W + 1) + dh * W + dw            # static offset into padded-flat rows
            xs = t_ref[off:off + HW, :]
            xs = jnp.where(jnp.logical_and(hv, wv), xs, jnp.zeros_like(xs))
            acc = acc + jnp.dot(xs, w2_ref[(dh + 1) * 3 + (dw + 1)],
                                preferred_element_type=jnp.float32)
    acc = acc + b2_ref[...]
    o_ref[0] = _silu(acc).astype(o_ref.dtype)


def bottleneck_block(x_img, p):
    """One Bottleneck(shortcut=False, e=1.0) as a single pallas_call per batch image."""
    # TODO(synk): for very large H*W the per-image block should be row-tiled with a
    # halo DMA instead of one (H*W + 2W + 2)-row block.
    B, H, W, Cin = x_img.shape
    w1, b1 = fold_bn(p["cv1"]["w"], p["cv1"]["bn"])
    Cmid = w1.shape[-1]
    w2, b2 = fold_bn(p["cv2"]["w"], p["cv2"]["bn"])
    Cout = w2.shape[-1]
    L = H * W + 2 * W + 2
    xpf = jnp.pad(x_img.reshape(B, H * W, Cin).astype(_BF16),
                  ((0, 0), (W + 1, W + 1), (0, 0)))
    out = pl.pallas_call(
        functools.partial(_bottleneck_kernel, H=H, W=W),
        out_shape=jax.ShapeDtypeStruct((B, H * W, Cout), _BF16),
        grid=(B,),
        in_specs=[
            pl.BlockSpec((1, L, Cin), lambda i: (i, 0, 0)),
            pl.BlockSpec((Cin, Cmid), lambda i: (0, 0)),
            pl.BlockSpec((1, Cmid), lambda i: (0, 0)),
            pl.BlockSpec((9, Cmid, Cout), lambda i: (0, 0, 0)),
            pl.BlockSpec((1, Cout), lambda i: (0, 0)),
        ],
        out_specs=pl.BlockSpec((1, H * W, Cout), lambda i: (i, 0, 0)),
        scratch_shapes=[pltpu.VMEM((L, Cmid), _BF16)],
        compiler_params=pltpu.CompilerParams(
            dimension_semantics=("parallel",), vmem_limit_bytes=_VMEM_LIMIT),
    )(xpf,
      w1.reshape(Cin, Cmid).astype(_BF16), b1.reshape(1, Cmid).astype(_F32),
      w2.reshape(9, Cmid, Cout).astype(_BF16), b2.reshape(1, Cout).astype(_F32))
    return out.reshape(B, H, W, Cout)


# ----------------------------------------------------------------------------
# Kernel 3: BCSP tail — cv3(y), cv2(x), BN+LeakyReLU over the (virtual) concat,
# cv4 (+BN+SiLU) as a split-K matmul.  No concat / bn tensor ever hits HBM.
# ----------------------------------------------------------------------------
def _bcsp_tail_kernel(*refs, n_x):
    y_ref = refs[0]
    x_refs = refs[1:1 + n_x]
    w3_ref = refs[1 + n_x]
    w2_refs = refs[2 + n_x:2 + 2 * n_x]
    bnp_ref = refs[2 + 2 * n_x]
    w4_ref = refs[3 + 2 * n_x]
    b4_ref = refs[4 + 2 * n_x]
    o_ref = refs[5 + 2 * n_x]

    y1 = jnp.dot(y_ref[...], w3_ref[...], preferred_element_type=jnp.float32)
    y2 = jnp.dot(x_refs[0][...], w2_refs[0][...], preferred_element_type=jnp.float32)
    for i in range(1, n_x):
        y2 = y2 + jnp.dot(x_refs[i][...], w2_refs[i][...],
                          preferred_element_type=jnp.float32)
    h1 = _leaky(y1 * bnp_ref[0] + bnp_ref[1]).astype(jnp.bfloat16)
    h2 = _leaky(y2 * bnp_ref[2] + bnp_ref[3]).astype(jnp.bfloat16)
    z = (jnp.dot(h1, w4_ref[0], preferred_element_type=jnp.float32)
         + jnp.dot(h2, w4_ref[1], preferred_element_type=jnp.float32)
         + b4_ref[...])
    o_ref[...] = _silu(z).astype(o_ref.dtype)


def bcsp_tail(y_flat, x_parts, p):
    M, c_ = y_flat.shape
    c1 = sum(x.shape[1] for x in x_parts)
    c2 = p["cv4"]["w"].shape[-1]
    eps = 1e-5
    s = p["bn"]["gamma"] / jnp.sqrt(p["bn"]["var"] + eps)
    t = p["bn"]["beta"] - p["bn"]["mean"] * s
    bnp = jnp.stack([s[:c_], t[:c_], s[c_:], t[c_:]]).reshape(4, 1, c_).astype(_F32)
    w3 = p["cv3_w"].reshape(c_, c_).astype(_BF16)
    w2_full = p["cv2_w"].reshape(c1, c_)
    w2_parts, off = [], 0
    for x in x_parts:
        ci = x.shape[1]
        w2_parts.append(w2_full[off:off + ci].astype(_BF16))
        off += ci
    w4, b4 = fold_bn(p["cv4"]["w"], p["cv4"]["bn"])
    w4 = w4.reshape(2, c_, c2).astype(_BF16)
    b4 = b4.reshape(1, c2).astype(_F32)

    tm = min(512, _round_up(M, 8))
    Mp = _round_up(M, tm)
    y_flat = y_flat.astype(_BF16)
    x_parts = [x.astype(_BF16) for x in x_parts]
    if Mp != M:
        y_flat = jnp.pad(y_flat, ((0, Mp - M), (0, 0)))
        x_parts = [jnp.pad(x, ((0, Mp - M), (0, 0))) for x in x_parts]

    n_x = len(x_parts)
    in_specs = ([pl.BlockSpec((tm, c_), lambda i: (i, 0))]
                + [pl.BlockSpec((tm, x.shape[1]), lambda i: (i, 0)) for x in x_parts]
                + [pl.BlockSpec((c_, c_), lambda i: (0, 0))]
                + [pl.BlockSpec((w.shape[0], c_), lambda i: (0, 0)) for w in w2_parts]
                + [pl.BlockSpec((4, 1, c_), lambda i: (0, 0, 0)),
                   pl.BlockSpec((2, c_, c2), lambda i: (0, 0, 0)),
                   pl.BlockSpec((1, c2), lambda i: (0, 0))])
    out = pl.pallas_call(
        functools.partial(_bcsp_tail_kernel, n_x=n_x),
        out_shape=jax.ShapeDtypeStruct((Mp, c2), _BF16),
        grid=(Mp // tm,),
        in_specs=in_specs,
        out_specs=pl.BlockSpec((tm, c2), lambda i: (i, 0)),
        compiler_params=pltpu.CompilerParams(
            dimension_semantics=("parallel",), vmem_limit_bytes=_VMEM_LIMIT),
    )(y_flat, *x_parts, w3, *w2_parts, bnp, w4, b4)
    return out[:M] if Mp != M else out


# ----------------------------------------------------------------------------
# Kernel 4: fused cross-attention — v/qk linears, per-head softmax attention and
# linear_restore in ONE kernel per batch.
# ----------------------------------------------------------------------------
def _attn_fused_kernel(vt_ref, qt_ref, wv_ref, bv_ref, wqk_ref, bqk_ref,
                       wr_ref, br_ref, o_ref, *, nhead, head_dim, scale):
    ci = nhead * head_dim
    v_all = (jnp.dot(vt_ref[0], wv_ref[...], preferred_element_type=jnp.float32)
             + bv_ref[...]).astype(jnp.bfloat16)
    qk_all = (jnp.dot(qt_ref[0], wqk_ref[...], preferred_element_type=jnp.float32)
              + bqk_ref[...])
    q_all = qk_all[:, :ci].astype(jnp.bfloat16)
    k_all = qk_all[:, ci:].astype(jnp.bfloat16)
    acc = jnp.zeros((o_ref.shape[-2], o_ref.shape[-1]), jnp.float32)
    for h in range(nhead):
        sl = slice(h * head_dim, (h + 1) * head_dim)
        q, k, v = q_all[:, sl], k_all[:, sl], v_all[:, sl]
        s = jax.lax.dot_general(q, k, (((1,), (1,)), ((), ())),
                                preferred_element_type=jnp.float32) * scale
        s = s - jnp.max(s, axis=-1, keepdims=True)
        p = jnp.exp(s)
        p = p * pl.reciprocal(jnp.sum(p, axis=-1, keepdims=True), approx=True)
        oh = jnp.dot(p.astype(jnp.bfloat16), v, preferred_element_type=jnp.float32)
        acc = acc + jnp.dot(oh.astype(jnp.bfloat16), wr_ref[h],
                            preferred_element_type=jnp.float32)
    o_ref[0] = (acc + br_ref[...]).astype(o_ref.dtype)


def fused_attention(v_tok, qk_tok, prm):
    """v/qk Linear -> multi-head softmax attention -> linear_restore (one pallas_call).
    attn_drop / proj_drop are identity (p=0); self.proj is unused in forward()."""
    b, n_tok, ch3 = v_tok.shape
    nhead, hd = prm["nhead"], prm["head_dim"]
    ci = nhead * hd
    scale = hd ** (-0.5)
    wr = prm["restore_w"].reshape(nhead, hd, ch3).astype(_BF16)
    vec = lambda v: v.reshape(1, -1).astype(_F32)
    tok_spec = pl.BlockSpec((1, n_tok, ch3), lambda i: (i, 0, 0))
    return pl.pallas_call(
        functools.partial(_attn_fused_kernel, nhead=nhead, head_dim=hd, scale=scale),
        out_shape=jax.ShapeDtypeStruct((b, n_tok, ch3), _BF16),
        grid=(b,),
        in_specs=[tok_spec, tok_spec,
                  pl.BlockSpec((ch3, ci), lambda i: (0, 0)),
                  pl.BlockSpec((1, ci), lambda i: (0, 0)),
                  pl.BlockSpec((ch3, 2 * ci), lambda i: (0, 0)),
                  pl.BlockSpec((1, 2 * ci), lambda i: (0, 0)),
                  pl.BlockSpec((nhead, hd, ch3), lambda i: (0, 0, 0)),
                  pl.BlockSpec((1, ch3), lambda i: (0, 0))],
        out_specs=tok_spec,
        compiler_params=pltpu.CompilerParams(
            dimension_semantics=("parallel",), vmem_limit_bytes=_VMEM_LIMIT),
    )(v_tok.astype(_BF16), qk_tok.astype(_BF16),
      prm["v_w"].astype(_BF16), vec(prm["v_b"]),
      prm["qk_w"].astype(_BF16), vec(prm["qk_b"]),
      wr, vec(prm["restore_b"]))


# ----------------------------------------------------------------------------
# Kernel 5: GAP channel attention fuse:  x3_add_out + x3_cat * GAP(x4_up)
# ----------------------------------------------------------------------------
def _gap_fuse_kernel(xc_ref, xu_ref, xa_ref, o_ref):
    gap = jnp.mean(xu_ref[...].astype(jnp.float32), axis=1, keepdims=True)  # (B,1,C)
    o_ref[...] = (xa_ref[...].astype(jnp.float32)
                  + xc_ref[...].astype(jnp.float32) * gap).astype(o_ref.dtype)


def pallas_gap_fuse(x3_cat, x4_up, x3_add_out):
    B, H, W, C = x3_cat.shape
    shape3 = (B, H * W, C)
    spec = pl.BlockSpec(shape3, lambda i: (0, 0, 0))
    out = pl.pallas_call(
        _gap_fuse_kernel,
        out_shape=jax.ShapeDtypeStruct(shape3, _BF16),
        grid=(1,),
        in_specs=[spec, spec, spec],
        out_specs=spec,
        compiler_params=pltpu.CompilerParams(
            dimension_semantics=("arbitrary",), vmem_limit_bytes=_VMEM_LIMIT),
    )(x3_cat.reshape(shape3).astype(_BF16),
      x4_up.reshape(shape3).astype(_BF16),
      x3_add_out.reshape(shape3).astype(_BF16))
    return out.reshape(B, H, W, C)


# ----------------------------------------------------------------------------
# Plain-JAX glue (layout only)
# ----------------------------------------------------------------------------
def upsample_nearest(x, f):
    # TODO(synk): fold the nearest-upsample into the consuming kernel's index_map
    # instead of materializing the f^2-larger tensor in HBM.
    return jnp.repeat(jnp.repeat(x, f, axis=1), f, axis=2)


def patchify(x, p):
    B, H, W, C = x.shape
    Hp, Wp = H // p, W // p
    xr = x.reshape(B, Hp, p, Wp, p, C).transpose(0, 1, 3, 2, 4, 5)
    return xr.reshape(B * Hp * Wp, p * p * C)


# ----------------------------------------------------------------------------
# BottleneckCSP
# ----------------------------------------------------------------------------
def bcsp_forward(x_parts, p):
    """BottleneckCSP(shortcut=False) on the channel-concat of `x_parts` (the concat is
    never materialized: cv1 / cv2 take channel-split inputs).
    TODO(synk): BottleneckCSP source not included in the reference; implemented as the
    standard YOLOv5/YOLOP BottleneckCSP (Conv = conv+BN+SiLU, csp act = LeakyReLU(0.1))."""
    B, H, W = x_parts[0].shape[:3]
    M = B * H * W
    a_parts = [xp_.reshape(M, xp_.shape[-1]) for xp_ in x_parts]

    # head: cv1 (1x1 Conv + BN + SiLU), split over input parts
    w1, b1 = fold_bn(p["cv1"]["w"], p["cv1"]["bn"])
    c_ = w1.shape[-1]
    w1 = w1.reshape(-1, c_)
    w1_parts, off = [], 0
    for a in a_parts:
        ci = a.shape[1]
        w1_parts.append(w1[off:off + ci])
        off += ci
    y = pallas_linear(a_parts, w1_parts, b1, act="silu")

    # m chain: each Bottleneck is one fused kernel
    y_img = y.reshape(B, H, W, c_)
    for mb in p["m"]:
        y_img = bottleneck_block(y_img, mb)

    # tail: cv3 / cv2 / BN+LeakyReLU / cv4+BN+SiLU fused
    out = bcsp_tail(y_img.reshape(M, c_), a_parts, p)
    return out.reshape(B, H, W, out.shape[-1])


# ----------------------------------------------------------------------------
# Deterministic parameter initialization
# ----------------------------------------------------------------------------
def _normal(key, shape, scale):
    return (scale * jax.random.normal(key, shape)).astype(jnp.float32)


def init_bn(key, c):
    k1, k2, k3, k4 = jax.random.split(key, 4)
    return dict(gamma=1.0 + _normal(k1, (c,), 0.1),
                beta=_normal(k2, (c,), 0.1),
                mean=_normal(k3, (c,), 0.1),
                var=jnp.abs(1.0 + _normal(k4, (c,), 0.1)))


def init_conv_bn(key, cin, cout, k):
    k1, k2 = jax.random.split(key)
    return dict(w=_normal(k1, (k, k, cin, cout), (k * k * cin) ** -0.5),
                bn=init_bn(k2, cout))


def init_bcsp(key, c1, c2, n):
    c_ = c2 // 2
    keys = jax.random.split(key, 5 + 2 * n)
    m = [dict(cv1=init_conv_bn(keys[5 + 2 * i], c_, c_, 1),
              cv2=init_conv_bn(keys[6 + 2 * i], c_, c_, 3)) for i in range(n)]
    return dict(
        cv1=init_conv_bn(keys[0], c1, c_, 1),
        cv2_w=_normal(keys[1], (1, 1, c1, c_), c1 ** -0.5),
        cv3_w=_normal(keys[2], (1, 1, c_, c_), c_ ** -0.5),
        cv4=init_conv_bn(keys[3], 2 * c_, c2, 1),
        bn=init_bn(keys[4], 2 * c_),
        m=m,
    )


def init_hffm(key, ch3, ch4, nhead=3, patch_size=2):
    head_dim = ch3                       # module overrides head_dim = ch_x3
    ch_inner = nhead * head_dim
    keys = jax.random.split(key, 11)
    # NOTE: self.proj / self.proj_drop exist in __init__ but are never used in forward().
    # NOTE: qk_w here uses a [Wq | Wk] column layout; PyTorch's interleaved
    # (..., head_dim, 2) view would require a column permutation when importing
    # trained weights (self-consistent for random init).
    return dict(
        nhead=nhead, head_dim=head_dim, patch_size=patch_size,
        x4_upconv=init_bcsp(keys[0], ch4, ch3, 1),
        patch_w=_normal(keys[1], (patch_size, patch_size, ch3, ch3),
                        (patch_size * patch_size * ch3) ** -0.5),
        patch_b=_normal(keys[2], (ch3,), 0.1),
        v_w=_normal(keys[3], (ch3, ch_inner), ch3 ** -0.5),
        v_b=_normal(keys[4], (ch_inner,), 0.1),
        qk_w=_normal(keys[5], (ch3, 2 * ch_inner), ch3 ** -0.5),
        qk_b=_normal(keys[6], (2 * ch_inner,), 0.1),
        restore_w=_normal(keys[7], (ch_inner, ch3), ch_inner ** -0.5),
        restore_b=_normal(keys[8], (ch3,), 0.1),
        cat_conv=init_bcsp(keys[9], 2 * ch3, ch3, 1),
        out=init_bcsp(keys[10], ch3, ch3, 3),
    )


# ----------------------------------------------------------------------------
# HierarchicalFFM forward
# ----------------------------------------------------------------------------
def hierarchical_ffm(params, x3_nchw, x4_nchw):
    ps = params["patch_size"]

    # NCHW -> NHWC, bf16 activations (f32 accumulation inside every kernel)
    x3 = jnp.transpose(x3_nchw, (0, 2, 3, 1)).astype(_BF16)
    x4 = jnp.transpose(x4_nchw, (0, 2, 3, 1)).astype(_BF16)
    b, h, w, ch3 = x3.shape

    # --- 1. cross attention ---
    x4_up = bcsp_forward([upsample_nearest(x4, 2)], params["x4_upconv"])
    x3_add = x3 + x4_up

    # both PatchEmbeds share weights -> single matmul with doubled M
    tok_in = patchify(jnp.concatenate([x3, x3_add], axis=0), ps)
    tok = pallas_linear([tok_in], [params["patch_w"].reshape(ps * ps * ch3, ch3)],
                        params["patch_b"], act="none")
    n_tok = (h // ps) * (w // ps)
    v_tok = tok[:b * n_tok].reshape(b, n_tok, ch3)
    qk_tok = tok[b * n_tok:].reshape(b, n_tok, ch3)

    x_mt = fused_attention(v_tok, qk_tok, params)                 # (b, N, ch3)
    x_mt = x_mt.reshape(b, h // ps, w // ps, ch3)
    if ps > 1:
        x_mt = upsample_nearest(x_mt, ps)
    x3_add_out = x3 + x_mt

    # --- 2. gap channel attention ---
    x3_cat = bcsp_forward([x3_add_out, x4_up], params["cat_conv"])   # concat never built
    fused = pallas_gap_fuse(x3_cat, x4_up, x3_add_out)
    out = bcsp_forward([fused], params["out"]) + fused
    return jnp.transpose(out, (0, 3, 1, 2)).astype(jnp.float32)      # back to NCHW


# ----------------------------------------------------------------------------
if __name__ == "__main__":
    key = jax.random.PRNGKey(0)
    kp, k3, k4 = jax.random.split(key, 3)

    b, ch3, ch4, h, w = 2, 8, 16, 16, 16     # x3: b c h/8 w/8, x4: b 2c h/16 w/16
    params = init_hffm(kp, ch3, ch4, nhead=3, patch_size=2)

    x3 = jax.random.normal(k3, (b, ch3, h, w), jnp.float32)
    x4 = jax.random.normal(k4, (b, ch4, h // 2, w // 2), jnp.float32)

    out = hierarchical_ffm(params, x3, x4)
    jax.block_until_ready(out)
    assert out.shape == (b, ch3, h, w), out.shape
    assert bool(jnp.all(jnp.isfinite(out)))
    print("KERNEL_OK")
</pallas_src>

<mosaic_0001>
module attributes {stable_mosaic.version = 11 : i64} {
  func.func @_linear_kernel(%arg0: i32, %arg1: memref<512x16xbf16, #tpu.memory_space<vmem>>, %arg2: memref<16x4xbf16, #tpu.memory_space<vmem>>, %arg3: memref<1x4xf32, #tpu.memory_space<vmem>>, %arg4: memref<512x4xbf16, #tpu.memory_space<vmem>>) attributes {dimension_semantics = [#tpu.dimension_semantics<parallel>], iteration_bounds = array<i64: 1>, scalar_prefetch = 0 : i64, scratch_operands = 0 : i64, tpu.core_type = #tpu.core_type<tc>, window_params = [{transform_indices = @transform_0, window_bounds = array<i64: 512, 16>}, {pipeline_mode = #tpu.pipeline_mode<synchronous>, transform_indices = @transform_1, window_bounds = array<i64: 16, 4>}, {pipeline_mode = #tpu.pipeline_mode<synchronous>, transform_indices = @transform_2, window_bounds = array<i64: 1, 4>}, {transform_indices = @transform_3, window_bounds = array<i64: 512, 4>}]} {
    %c0 = arith.constant 0 : index
    %c0_0 = arith.constant 0 : index
    %0 = vector.load %arg1[%c0, %c0_0] : memref<512x16xbf16, #tpu.memory_space<vmem>>, vector<512x16xbf16>
    %c0_1 = arith.constant 0 : index
    %c0_2 = arith.constant 0 : index
    %1 = vector.load %arg2[%c0_1, %c0_2] : memref<16x4xbf16, #tpu.memory_space<vmem>>, vector<16x4xbf16>
    %cst = arith.constant dense<0.000000e+00> : vector<512x4xf32>
    %2 = tpu.matmul %0, %1, %cst {dimension_numbers = #tpu.dot_dimension_numbers<[1], [0], [0], [1], [0, 0, 1, 1], [], []>} : vector<512x16xbf16>, vector<16x4xbf16>, vector<512x4xf32> -> vector<512x4xf32>
    %c0_3 = arith.constant 0 : index
    %c0_4 = arith.constant 0 : index
    %3 = vector.load %arg3[%c0_3, %c0_4] : memref<1x4xf32, #tpu.memory_space<vmem>>, vector<1x4xf32>
    %4 = vector.broadcast %3 : vector<1x4xf32> to vector<512x4xf32>
    %5 = arith.addf %2, %4 : vector<512x4xf32>
    %6 = arith.negf %5 : vector<512x4xf32>
    %7 = math.exp %6 : vector<512x4xf32>
    %cst_5 = arith.constant 1.000000e+00 : f32
    %8 = vector.broadcast %cst_5 : f32 to vector<512x4xf32>
    %9 = arith.addf %8, %7 : vector<512x4xf32>
    %10 = arith.divf %8, %9 : vector<512x4xf32>
    %11 = arith.mulf %5, %10 : vector<512x4xf32>
    %12 = arith.truncf %11 : vector<512x4xf32> to vector<512x4xbf16>
    %c0_6 = arith.constant 0 : index
    %c0_7 = arith.constant 0 : index
    %13 = vector.load %arg4[%c0_6, %c0_7] : memref<512x4xbf16, #tpu.memory_space<vmem>>, vector<512x4xbf16>
    tpu.vector_store %arg4[%c0_6, %c0_7], %12 {strides = array<i32>} : memref<512x4xbf16, #tpu.memory_space<vmem>>, vector<512x4xbf16>,
    return
  }
  func.func @transform_0(%arg0: i32) -> (i32, i32) {
    %c0_i32 = arith.constant 0 : i32
    %c0_i32_0 = arith.constant 0 : i32
    return %arg0, %c0_i32 : i32, i32
  }
  func.func @transform_1(%arg0: i32) -> (i32, i32) {
    %c0_i32 = arith.constant 0 : i32
    %c0_i32_0 = arith.constant 0 : i32
    %c0_i32_1 = arith.constant 0 : i32
    return %c0_i32, %c0_i32_0 : i32, i32
  }
  func.func @transform_2(%arg0: i32) -> (i32, i32) {
    %c0_i32 = arith.constant 0 : i32
    %c0_i32_0 = arith.constant 0 : i32
    %c0_i32_1 = arith.constant 0 : i32
    return %c0_i32, %c0_i32_0 : i32, i32
  }
  func.func @transform_3(%arg0: i32) -> (i32, i32) {
    %c0_i32 = arith.constant 0 : i32
    %c0_i32_0 = arith.constant 0 : i32
    return %arg0, %c0_i32 : i32, i32
  }
}

</mosaic_0001>

<bundles_post_ra>
// kernel: tpu_custom_call.1
= control target key start
LH: loop header
LB: loop body
LE: loop exit
PB: predicated region body
PF: predicated region fallthrough
CT: control target
= control target key end

     0   :  { %vm251_vm0 = vcmask 130048   ;;  %vm1861_vm6 = vcmask 27648   ;;  %s4086_s1 = inlined_call_operand.vmem [shape: bf16[16,4], index: 1, kind: input, shape index: {}]   ;;  %s4087_s0 = inlined_call_operand.vmem [shape: bf16[512,16], index: 0, kind: input, shape index: {}]   ;;  %s4088_s2 = inlined_call_operand.vmem [shape: f32[1,4], index: 2, kind: input, shape index: {}]   ;;  %s4089_s3 = inlined_call_operand.vmem [shape: bf16[512,4], index: 3, kind: output, shape index: {}]  }
   0x1   :  { %v2190_v0 = vld [vmem:[%s4086_s1] sm:$0xff]  ;;  %v2159_v5 = vld [vmem:[%s4087_s0 + $0x8] sm:$0xff]  ;;  %v2160_v9 = vld [vmem:[%s4087_s0 + $0x10] sm:$0xff] }
   0x2   :  { %v2158_v1 = vld [vmem:[%s4087_s0] sm:$0xff]  ;;  %355 = vmatpush.bf16.msra.mxu0 %v2190_v0  ;;  %2191 = vmatpush.bf16.msra.mxu1 %v2190_v0  ;;  %v2167_v6 = vld [vmem:[%s4087_s0 + $0x48] sm:$0xff]  ;;  %v2168_v10 = vld [vmem:[%s4087_s0 + $0x50] sm:$0xff] }
   0x3   :  { %v2166_v2 = vld [vmem:[%s4087_s0 + $0x40] sm:$0xff]  ;;  %2192 = vmatpush.bf16.msra.mxu2 %v2190_v0  ;;  %2193 = vmatpush.bf16.msra.mxu3 %v2190_v0  ;;  %v2175_v7 = vld [vmem:[%s4087_s0 + $0x88] sm:$0xff]  ;;  %v2176_v11 = vld [vmem:[%s4087_s0 + $0x90] sm:$0xff] }
   0x4   :  { %v2174_v3 = vld [vmem:[%s4087_s0 + $0x80] sm:$0xff]  ;;  %v2183_v8 = vld [vmem:[%s4087_s0 + $0xc8] sm:$0xff]  ;;  %v2184_v12 = vld [vmem:[%s4087_s0 + $0xd0] sm:$0xff] }
   0x5   :  { %v2182_v4 = vld [vmem:[%s4087_s0 + $0xc0] sm:$0xff]  ;;  %2062 = vmatmul.msk.bf16.vlgmr.msra.gmra.mxu0 %vm251_vm0, %v2158_v1  ;;  %2070 = vmatmul.msk.bf16.vlgmr.msra.gmra.mxu1 %vm251_vm0, %v2166_v2  ;;  %v2161_v13 = vld [vmem:[%s4087_s0 + $0x18] sm:$0xff]  ;;  %v2163_v21 = vld [vmem:[%s4087_s0 + $0x28] sm:$0xff] }
   0x6   :  { %2078 = vmatmul.msk.bf16.vlgmr.msra.gmra.mxu2 %vm251_vm0, %v2174_v3  ;;  %2086 = vmatmul.msk.bf16.vlgmr.msra.gmra.mxu3 %vm251_vm0, %v2182_v4  ;;  %v2169_v14 = vld [vmem:[%s4087_s0 + $0x58] sm:$0xff]  ;;  %v2162_v17 = vld [vmem:[%s4087_s0 + $0x20] sm:$0xff]  ;;  %v2171_v22 = vld [vmem:[%s4087_s0 + $0x68] sm:$0xff] }
   0x7   :  { %v2177_v15 = vld [vmem:[%s4087_s0 + $0x98] sm:$0xff]  ;;  %v2170_v18 = vld [vmem:[%s4087_s0 + $0x60] sm:$0xff]  ;;  %v2179_v23 = vld [vmem:[%s4087_s0 + $0xa8] sm:$0xff] }
   0x8   :  { %v2185_v16 = vld [vmem:[%s4087_s0 + $0xd8] sm:$0xff]  ;;  %v2178_v19 = vld [vmem:[%s4087_s0 + $0xa0] sm:$0xff]  ;;  %v2187_v24 = vld [vmem:[%s4087_s0 + $0xe8] sm:$0xff] }
   0x9   :  { %v2186_v20 = vld [vmem:[%s4087_s0 + $0xe0] sm:$0xff]  ;;  %v2164_v25 = vld [vmem:[%s4087_s0 + $0x30] sm:$0xff]  ;;  %v2165_v29 = vld [vmem:[%s4087_s0 + $0x38] sm:$0xff] }
   0xa   :  { %v2172_v26 = vld [vmem:[%s4087_s0 + $0x70] sm:$0xff]  ;;  %v2173_v30 = vld [vmem:[%s4087_s0 + $0x78] sm:$0xff]  ;;  %v2607_v33 = vld [vmem:[%s4088_s2] ss:$0 sm:$0xff] }
   0xb   :  { %v2180_v27 = vld [vmem:[%s4087_s0 + $0xb0] sm:$0xff]  ;;  %v2181_v31 = vld [vmem:[%s4087_s0 + $0xb8] sm:$0xff] }
   0xc   :  { %v2188_v28 = vld [vmem:[%s4087_s0 + $0xf0] sm:$0xff]  ;;  %v2189_v32 = vld [vmem:[%s4087_s0 + $0xf8] sm:$0xff] }
  0x15   :  { %2063 = vmatmul.msk.bf16.gmra.mxu0 %vm251_vm0, %v2159_v5  ;;  %2071 = vmatmul.msk.bf16.gmra.mxu1 %vm251_vm0, %v2167_v6 }
  0x16   :  { %2079 = vmatmul.msk.bf16.gmra.mxu2 %vm251_vm0, %v2175_v7  ;;  %2087 = vmatmul.msk.bf16.gmra.mxu3 %vm251_vm0, %v2183_v8 }
  0x25   :  { %2064 = vmatmul.msk.bf16.gmra.mxu0 %vm251_vm0, %v2160_v9  ;;  %2072 = vmatmul.msk.bf16.gmra.mxu1 %vm251_vm0, %v2168_v10 }
  0x26   :  { %2080 = vmatmul.msk.bf16.gmra.mxu2 %vm251_vm0, %v2176_v11  ;;  %2088 = vmatmul.msk.bf16.gmra.mxu3 %vm251_vm0, %v2184_v12 }
  0x35   :  { %2065 = vmatmul.msk.bf16.gmra.mxu0 %vm251_vm0, %v2161_v13  ;;  %2073 = vmatmul.msk.bf16.gmra.mxu1 %vm251_vm0, %v2169_v14 }
  0x36   :  { %2081 = vmatmul.msk.bf16.gmra.mxu2 %vm251_vm0, %v2177_v15  ;;  %2089 = vmatmul.msk.bf16.gmra.mxu3 %vm251_vm0, %v2185_v16 }
  0x45   :  { %2066 = vmatmul.msk.bf16.gmra.mxu0 %vm251_vm0, %v2162_v17  ;;  %2074 = vmatmul.msk.bf16.gmra.mxu1 %vm251_vm0, %v2170_v18 }
  0x46   :  { %2082 = vmatmul.msk.bf16.gmra.mxu2 %vm251_vm0, %v2178_v19  ;;  %2090 = vmatmul.msk.bf16.gmra.mxu3 %vm251_vm0, %v2186_v20 }
  0x55   :  { %2067 = vmatmul.msk.bf16.gmra.mxu0 %vm251_vm0, %v2163_v21  ;;  %2075 = vmatmul.msk.bf16.gmra.mxu1 %vm251_vm0, %v2171_v22 }
  0x56   :  { %2083 = vmatmul.msk.bf16.gmra.mxu2 %vm251_vm0, %v2179_v23  ;;  %2091 = vmatmul.msk.bf16.gmra.mxu3 %vm251_vm0, %v2187_v24 }
  0x65   :  { %2068 = vmatmul.msk.bf16.gmra.mxu0 %vm251_vm0, %v2164_v25  ;;  %2076 = vmatmul.msk.bf16.gmra.mxu1 %vm251_vm0, %v2172_v26 }
  0x66   :  { %2084 = vmatmul.msk.bf16.gmra.mxu2 %vm251_vm0, %v2180_v27  ;;  %2092 = vmatmul.msk.bf16.gmra.mxu3 %vm251_vm0, %v2188_v28 }
  0x75   :  { %2069 = vmatmul.msk.bf16.gmra.mxu0 %vm251_vm0, %v2165_v29  ;;  %2077 = vmatmul.msk.bf16.gmra.mxu1 %vm251_vm0, %v2173_v30 }
  0x76   :  { %2085 = vmatmul.msk.bf16.gmra.mxu2 %vm251_vm0, %v2181_v31  ;;  %2093 = vmatmul.msk.bf16.gmra.mxu3 %vm251_vm0, %v2189_v32 }
  0x82   :  { %v357_v34 = vpop.f32.mrf.mxu0  ;;  %v397_v35 = vpop.f32.mrf.mxu1 }
  0x83   :  { %v2610_v36 = vadd.f32 %v2607_v33, %v357_v34  ;;  %v2613_v37 = vadd.f32 %v2607_v33, %v397_v35 }
  0x85   :  { %v2094_v38 = vmul.f32 -1.442695, %v2610_v36  ;;  %v2110_v39 = vmul.f32 -1.442695, %v2613_v37 }
  0x87   :  { %2195 = vpow2.f32 %v2094_v38 }
  0x88   :  { %2197 = vpow2.f32 %v2110_v39 }
  0x89   :  { %v437_v40 = vpop.f32.mrf.mxu2  ;;  %v477_v41 = vpop.f32.mrf.mxu3 }
  0x8a   :  { %v2618_v42 = vadd.f32 %v2607_v33, %v437_v40  ;;  %v2621_v43 = vadd.f32 %v2607_v33, %v477_v41  ;;  %v359_v44 = vpop.f32.mrf.mxu0  ;;  %v399_v45 = vpop.f32.mrf.mxu1 }
  0x8b   :  { %v2624_v46 = vadd.f32 %v2607_v33, %v359_v44  ;;  %v2627_v47 = vadd.f32 %v2607_v33, %v399_v45 }
  0x8c   :  { %v2126_v48 = vmul.f32 -1.442695, %v2618_v42  ;;  %v2142_v49 = vmul.f32 -1.442695, %v2621_v43 }
  0x8d   :  { %v2196_v50 = vpop.eup %2195  ;;  %v2095_v53 = vmul.f32 -1.442695, %v2624_v46  ;;  %v2111_v55 = vmul.f32 -1.442695, %v2627_v47 }
  0x8e   :  { %v2198_v51 = vpop.eup %2197  ;;  %v2631_v52 = vadd.f32 1.0, %v2196_v50  ;;  %2199 = vpow2.f32 %v2126_v48 }
  0x8f   :  { %v2634_v54 = vadd.f32 1.0, %v2198_v51  ;;  %2201 = vpow2.f32 %v2142_v49 }
  0x90   :  { %2203 = vrcp.f32 %v2631_v52  ;;  %v782_v60 = vand.u32 2147483647, %v2631_v52  ;;  %v784_v61 = vand.u32 2147483648, %v2631_v52  ;;  %vm778_vm1 = vweird.f32 %v2631_v52 }
  0x91   :  { %2205 = vrcp.f32 %v2634_v54  ;;  %v439_v56 = vpop.f32.mrf.mxu2  ;;  %v479_v57 = vpop.f32.mrf.mxu3  ;;  %v1022_v0 = vand.u32 2147483647, %v2634_v54  ;;  %v1024_v4 = vand.u32 2147483648, %v2634_v54  ;;  %vm1018_vm2 = vweird.f32 %v2634_v54 }
  0x92   :  { %2207 = vpow2.f32 %v2095_v53  ;;  %v2640_v58 = vadd.f32 %v2607_v33, %v439_v56  ;;  %v362_v59 = vpop.f32.mrf.mxu0  ;;  %v402_v62 = vpop.f32.mrf.mxu1  ;;  %v2647_v2 = vadd.f32 %v2607_v33, %v479_v57  ;;  %vm2663_vm3 = vcmp.eq.f32.partialorder %v782_v60, 8.507059e+37 }
  0x93   :  { %2209 = vpow2.f32 %v2111_v55  ;;  %v2653_v6 = vadd.f32 %v2607_v33, %v362_v59  ;;  %v2660_v9 = vadd.f32 %v2607_v33, %v402_v62  ;;  %v785_v13 = vor.u32 1.1754944e-38, %v784_v61 }
  0x94   :  { %v2200_v63 = vpop.eup %2199  ;;  %v2127_v1 = vmul.f32 -1.442695, %v2640_v58  ;;  %vm2669_vm4 = vcmp.eq.f32.partialorder %v1022_v0, 8.507059e+37  ;;  %v2143_v17 = vmul.f32 -1.442695, %v2647_v2  ;;  %v1025_v20 = vor.u32 1.1754944e-38, %v1024_v4 }
  0x95   :  { %v2202_v3 = vpop.eup %2201  ;;  %v2650_v5 = vadd.f32 1.0, %v2200_v63  ;;  %v2676_v21 = vmul.f32 -1.442695, %v2653_v6  ;;  %v2680_v24 = vmul.f32 -1.442695, %v2660_v9 }
  0x96   :  { %v2204_v7 = vpop.eup %2203  ;;  %v2657_v8 = vadd.f32 1.0, %v2202_v3 }
  0x97   :  { %v2206_v10 = vpop.eup %2205  ;;  %v774_v11 = vmul.f32 %v2204_v7, %v2631_v52  ;;  %2211 = vrcp.f32 %v2650_v5  ;;  %vm779_vm5 = vweird.f32 %v2204_v7  ;;  %v1262_v23 = vand.u32 2147483647, %v2650_v5 }
  0x98   :  { %v2208_v14 = vpop.eup %2207  ;;  %v1014_v15 = vmul.f32 %v2206_v10, %v2634_v54  ;;  %2213 = vpow2.f32 %v2127_v1  ;;  %v1264_v26 = vand.u32 2147483648, %v2650_v5  ;;  %vm1019_vm7 = vweird.f32 %v2206_v10  ;;  %vm780_vm9 = vmor %vm778_vm1, %vm779_vm5 }
  0x99   :  { %v2210_v18 = vpop.eup %2209  ;;  %v775_v19 = vsub.f32 1.0, %v774_v11  ;;  %2215 = vrcp.f32 %v2657_v8  ;;  %v2683_v27 = vadd.f32 1.0, %v2208_v14  ;;  %v1502_v30 = vand.u32 2147483647, %v2657_v8  ;;  %v442_v41 = vpop.f32.mrf.mxu2  ;;  %vm1020_vm12 = vmor %vm1018_vm2, %vm1019_vm7 }
  0x9a   :  { %v1015_v22 = vsub.f32 1.0, %v1014_v15  ;;  %v2685_v28 = vadd.f32 1.0, %v2210_v18  ;;  %2217 = vpow2.f32 %v2143_v17  ;;  %vm1258_vm8 = vweird.f32 %v2650_v5 }
  0x9b   :  { %v776_v25 = vmul.f32 %v2204_v7, %v775_v19  ;;  %v1504_v34 = vand.u32 2147483648, %v2657_v8  ;;  %2219 = vrcp.f32 %v2683_v27  ;;  %vm2695_vm10 = vcmp.eq.f32.partialorder %v1262_v23, 8.507059e+37 }
  0x9c   :  { %v1016_v29 = vmul.f32 %v2206_v10, %v1015_v22  ;;  %vm1498_vm11 = vweird.f32 %v2657_v8  ;;  %v1265_v48 = vor.u32 1.1754944e-38, %v1264_v26  ;;  %v797_v49 = vand.u32 2147483647, %v2683_v27 }
  0x9d   :  { %v2212_v31 = vpop.eup %2211  ;;  %v777_v32 = vadd.f32 %v2204_v7, %v776_v25  ;;  %2221 = vrcp.f32 %v2685_v28  ;;  %vm2708_vm13 = vcmp.eq.f32.partialorder %v1502_v30, 8.507059e+37  ;;  %v1505_v57 = vor.u32 1.1754944e-38, %v1504_v34 }
  0x9e   :  { %v2214_v35 = vpop.eup %2213  ;;  %v1017_v38 = vadd.f32 %v2206_v10, %v1016_v29  ;;  %v1254_v39 = vmul.f32 %v2212_v31, %v2650_v5  ;;  %v2716_v59 = vadd.f32 %v2607_v33, %v442_v41  ;;  %vm1259_vm14 = vweird.f32 %v2212_v31 }
  0x9f   :  { %v2216_v44 = vpop.eup %2215  ;;  %v781_v45 = vsel %vm780_vm9, %v2204_v7, %v777_v32  ;;  %vm793_vm15 = vweird.f32 %v2683_v27  ;;  %v2721_v3 = vadd.f32 1.0, %v2214_v35  ;;  %vm2724_vm1 = vcmp.eq.f32.partialorder %v797_v49, 8.507059e+37  ;;  %vm1260_vm2 = vmor %vm1258_vm8, %vm1259_vm14 }
  0xa0   :  { %v786_v50 = vsel %vm2663_vm3, %v785_v13, %v781_v45  ;;  %v1021_v51 = vsel %vm1020_vm12, %v2206_v10, %v1017_v38  ;;  %v1255_v52 = vsub.f32 1.0, %v1254_v39  ;;  %v1494_v53 = vmul.f32 %v2216_v44, %v2657_v8  ;;  %v2218_v60 = vpop.eup %2217 }
  0xa1   :  { %v1733_v56 = vmul.f32 %v786_v50, %v2610_v36  ;;  %v1026_v54 = vsel %vm2669_vm4, %v1025_v20, %v1021_v51  ;;  %v2220_v0 = vpop.eup %2219  ;;  %vm1499_vm0 = vweird.f32 %v2216_v44  ;;  %v799_v36 = vand.u32 2147483648, %v2683_v27 }
  0xa2   :  { %v1749_v61 = vmul.f32 %v1026_v54, %v2613_v37  ;;  %v1256_v62 = vmul.f32 %v2212_v31, %v1255_v52  ;;  %v1495_v63 = vsub.f32 1.0, %v1494_v53  ;;  %v789_v11 = vmul.f32 %v2220_v0, %v2683_v27  ;;  %vm1500_vm4 = vmor %vm1498_vm11, %vm1499_vm0  ;;  %v482_v27 = vpop.f32.mrf.mxu3  ;;  %v364_v53 = vpop.f32.mrf.mxu0 }
  0xa3   :  { %v1797_v1 = vpack.c.bf16 %v1733_v56, %v1733_v56  ;;  %v2222_v37 = vpop.eup %2221  ;;  %vm1033_vm3 = vweird.f32 %v2685_v28  ;;  %v1037_v13 = vand.u32 2147483647, %v2685_v28  ;;  %2223 = vrcp.f32 %v2721_v3 }
  0xa4   :  { %v1813_v4 = vpack.c.bf16 %v1749_v61, %v1749_v61  ;;  %v1257_v7 = vadd.f32 %v2212_v31, %v1256_v62  ;;  %v1496_v10 = vmul.f32 %v2216_v44, %v1495_v63  ;;  %v2738_v14 = vadd.f32 1.0, %v2218_v60 }
  0xa5   :  { %1862 = vst.msk [vmem:[%s4089_s3] sm:$0xf] %vm1861_vm6, %v1797_v1  ;;  %v790_v17 = vsub.f32 1.0, %v789_v11  ;;  %v1029_v18 = vmul.f32 %v2222_v37, %v2685_v28  ;;  %vm794_vm5 = vweird.f32 %v2220_v0  ;;  %vm1034_vm7 = vweird.f32 %v2222_v37 }
  0xa6   :  { %1878 = vst.msk [vmem:[%s4089_s3 + $0x40] sm:$0xf] %vm1861_vm6, %v1813_v4  ;;  %v1261_v15 = vsel %vm1260_vm2, %v2212_v31, %v1257_v7  ;;  %v1497_v16 = vadd.f32 %v2216_v44, %v1496_v10  ;;  %v1039_v19 = vand.u32 2147483648, %v2685_v28  ;;  %v1277_v29 = vand.u32 2147483647, %v2721_v3  ;;  %vm795_vm8 = vmor %vm793_vm15, %vm794_vm5 }
  0xa7   :  { %v1266_v5 = vsel %vm2695_vm10, %v1265_v48, %v1261_v15  ;;  %v791_v23 = vmul.f32 %v2220_v0, %v790_v17  ;;  %v1030_v25 = vsub.f32 1.0, %v1029_v18  ;;  %v1279_v30 = vand.u32 2147483648, %v2721_v3  ;;  %vm1035_vm11 = vmor %vm1033_vm3, %vm1034_vm7 }
  0xa8   :  { %v1765_v20 = vmul.f32 %v1266_v5, %v2618_v42  ;;  %v1501_v22 = vsel %vm1500_vm4, %v2216_v44, %v1497_v16  ;;  %2225 = vrcp.f32 %v2738_v14  ;;  %v800_v42 = vor.u32 1.1754944e-38, %v799_v36  ;;  %v444_v36 = vpop.f32.mrf.mxu2 }
  0xa9   :  { %v1506_v26 = vsel %vm2708_vm13, %v1505_v57, %v1501_v22  ;;  %v792_v32 = vadd.f32 %v2220_v0, %v791_v23  ;;  %v1031_v34 = vmul.f32 %v2222_v37, %v1030_v25  ;;  %v2224_v35 = vpop.eup %2223  ;;  %vm2761_vm9 = vcmp.eq.f32.partialorder %v1037_v13, 8.507059e+37  ;;  %v404_v57 = vpop.f32.mrf.mxu1 }
  0xaa   :  { %v1829_v8 = vpack.c.bf16 %v1765_v20, %v1765_v20  ;;  %v1781_v31 = vmul.f32 %v1506_v26, %v2621_v43  ;;  %v1040_v39 = vor.u32 1.1754944e-38, %v1039_v19  ;;  %vm1273_vm10 = vweird.f32 %v2721_v3  ;;  %v484_v20 = vpop.f32.mrf.mxu3 }
  0xab   :  { %v796_v40 = vsel %vm795_vm8, %v2220_v0, %v792_v32  ;;  %v1032_v41 = vadd.f32 %v2222_v37, %v1031_v34  ;;  %v1269_v44 = vmul.f32 %v2224_v35, %v2721_v3  ;;  %vm1274_vm12 = vweird.f32 %v2224_v35 }
  0xac   :  { %1894 = vst.msk [vmem:[%s4089_s3 + $0x80] sm:$0xf] %vm1861_vm6, %v1829_v8  ;;  %v1845_v43 = vpack.c.bf16 %v1781_v31, %v1781_v31  ;;  %v801_v45 = vsel %vm2724_vm1, %v800_v42, %v796_v40  ;;  %vm2776_vm13 = vcmp.eq.f32.partialorder %v1277_v29, 8.507059e+37  ;;  %v1280_v49 = vor.u32 1.1754944e-38, %v1279_v30  ;;  %vm1275_vm15 = vmor %vm1273_vm10, %vm1274_vm12  ;;  %v367_v29 = vpop.f32.mrf.mxu0 }
  0xad   :  { %v1734_v50 = vmul.f32 %v801_v45, %v2624_v46  ;;  %v1036_v51 = vsel %vm1035_vm11, %v2222_v37, %v1032_v41  ;;  %v1270_v52 = vsub.f32 1.0, %v1269_v44  ;;  %2227 = vpow2.f32 %v2676_v21 }
  0xae   :  { %1910 = vst.msk [vmem:[%s4089_s3 + $0xc0] sm:$0xf] %vm1861_vm6, %v1845_v43  ;;  %v2226_v28 = vpop.eup %2225  ;;  %v1041_v55 = vsel %vm2761_vm9, %v1040_v39, %v1036_v51  ;;  %2229 = vpow2.f32 %v2680_v24  ;;  %v2128_v56 = vmul.f32 -1.442695, %v2716_v59  ;;  %v2791_v54 = vadd.f32 %v2607_v33, %v482_v27 }
  0xaf   :  { %v1798_v60 = vpack.c.bf16 %v1734_v50, %v1734_v50  ;;  %v1750_v46 = vmul.f32 %v1041_v55, %v2627_v47  ;;  %v1271_v61 = vmul.f32 %v2224_v35, %v1270_v52  ;;  %v1509_v62 = vmul.f32 %v2226_v28, %v2738_v14 }
  0xb0   :  { %vm1513_vm14 = vweird.f32 %v2738_v14  ;;  %2231 = vpow2.f32 %v2128_v56  ;;  %v2144_v21 = vmul.f32 -1.442695, %v2791_v54  ;;  %v2798_v63 = vadd.f32 %v2607_v33, %v364_v53 }
  0xb1   :  { %1863 = vst.msk [vmem:[%s4089_s3 + $0x4] sm:$0xf] %vm1861_vm6, %v1798_v60  ;;  %v1814_v24 = vpack.c.bf16 %v1750_v46, %v1750_v46  ;;  %v1272_v0 = vadd.f32 %v2224_v35, %v1271_v61  ;;  %v1510_v1 = vsub.f32 1.0, %v1509_v62  ;;  %v2805_v47 = vadd.f32 %v2607_v33, %v404_v57 }
  0xb2   :  { %v1517_v4 = vand.u32 2147483647, %v2738_v14  ;;  %v1519_v7 = vand.u32 2147483648, %v2738_v14  ;;  %2233 = vpow2.f32 %v2144_v21  ;;  %v2097_v10 = vmul.f32 -1.442695, %v2798_v63 }
  0xb3   :  { %v2228_v11 = vpop.eup %2227  ;;  %1879 = vst.msk [vmem:[%s4089_s3 + $0x44] sm:$0xf] %vm1861_vm6, %v1814_v24  ;;  %v1276_v12 = vsel %vm1275_vm15, %v2224_v35, %v1272_v0  ;;  %v1511_v37 = vmul.f32 %v2226_v28, %v1510_v1  ;;  %vm1514_vm0 = vweird.f32 %v2226_v28  ;;  %v2113_v13 = vmul.f32 -1.442695, %v2805_v47 }
  0xb4   :  { %v2230_v3 = vpop.eup %2229  ;;  %v1281_v15 = vsel %vm2776_vm13, %v1280_v49, %v1276_v12  ;;  %v2820_v16 = vadd.f32 1.0, %v2228_v11  ;;  %2235 = vpow2.f32 %v2097_v10  ;;  %v2823_v17 = vadd.f32 %v2607_v33, %v444_v36  ;;  %vm1515_vm1 = vmor %vm1513_vm14, %vm1514_vm0 }
  0xb5   :  { %v1766_v18 = vmul.f32 %v1281_v15, %v2640_v58  ;;  %v1512_v5 = vadd.f32 %v2226_v28, %v1511_v37  ;;  %v2826_v19 = vadd.f32 1.0, %v2230_v3  ;;  %2237 = vpow2.f32 %v2113_v13 }
  0xb6   :  { %v2232_v22 = vpop.eup %2231  ;;  %v1520_v23 = vor.u32 1.1754944e-38, %v1519_v7  ;;  %2239 = vrcp.f32 %v2820_v16  ;;  %vm1518_vm2 = vcmp.eq.f32.partialorder %v1517_v4, 8.507059e+37  ;;  %v812_v8 = vand.u32 2147483647, %v2820_v16  ;;  %v487_v7 = vpop.f32.mrf.mxu3 }
  0xb7   :  { %v1830_v25 = vpack.c.bf16 %v1766_v18, %v1766_v18  ;;  %v1516_v26 = vsel %vm1515_vm1, %v2226_v28, %v1512_v5  ;;  %2241 = vrcp.f32 %v2826_v19  ;;  %v2129_v31 = vmul.f32 -1.442695, %v2823_v17 }
  0xb8   :  { %v2234_v30 = vpop.eup %2233  ;;  %v1521_v58 = vsel %vm1518_vm2, %v1520_v23, %v1516_v26  ;;  %v2835_v32 = vadd.f32 %v2607_v33, %v484_v20  ;;  %v814_v34 = vand.u32 2147483648, %v2820_v16  ;;  %v2843_v35 = vadd.f32 1.0, %v2232_v22 }
  0xb9   :  { %1895 = vst.msk [vmem:[%s4089_s3 + $0x84] sm:$0xf] %vm1861_vm6, %v1830_v25  ;;  %v1782_v14 = vmul.f32 %v1521_v58, %v2647_v2  ;;  %v2845_v42 = vadd.f32 1.0, %v2234_v30  ;;  %v1052_v39 = vand.u32 2147483647, %v2826_v19  ;;  %v1054_v43 = vand.u32 2147483648, %v2826_v19 }
  0xba   :  { %v2236_v38 = vpop.eup %2235  ;;  %v2850_v40 = vadd.f32 %v2607_v33, %v367_v29  ;;  %2243 = vrcp.f32 %v2843_v35  ;;  %vm808_vm3 = vweird.f32 %v2820_v16  ;;  %vm1048_vm4 = vweird.f32 %v2826_v19 }
  0xbb   :  { %v2238_v41 = vpop.eup %2237  ;;  %v1846_v44 = vpack.c.bf16 %v1782_v14, %v1782_v14  ;;  %2245 = vrcp.f32 %v2845_v42  ;;  %v2145_v2 = vmul.f32 -1.442695, %v2835_v32  ;;  %vm2862_vm5 = vcmp.eq.f32.partialorder %v812_v8, 8.507059e+37 }
  0xbc   :  { %v2240_v27 = vpop.eup %2239  ;;  %v815_v50 = vor.u32 1.1754944e-38, %v814_v34  ;;  %2247 = vpow2.f32 %v2129_v31  ;;  %vm2867_vm7 = vcmp.eq.f32.partialorder %v1052_v39, 8.507059e+37  ;;  %v1055_v53 = vor.u32 1.1754944e-38, %v1054_v43 }
  0xbd   :  { %v2242_v45 = vpop.eup %2241  ;;  %1911 = vst.msk [vmem:[%s4089_s3 + $0xc4] sm:$0xf] %vm1861_vm6, %v1846_v44  ;;  %v804_v48 = vmul.f32 %v2240_v27, %v2820_v16  ;;  %v1292_v28 = vand.u32 2147483647, %v2843_v35  ;;  %v2873_v55 = vmul.f32 -1.442695, %v2850_v40  ;;  %vm1288_vm8 = vweird.f32 %v2843_v35  ;;  %v407_v44 = vpop.f32.mrf.mxu1 }
  0xbe   :  { %v1044_v51 = vmul.f32 %v2242_v45, %v2826_v19  ;;  %v1294_v57 = vand.u32 2147483648, %v2843_v35  ;;  %v1532_v60 = vand.u32 2147483647, %v2845_v42  ;;  %v2877_v46 = vadd.f32 1.0, %v2236_v38 }
  0xbf   :  { %v805_v56 = vsub.f32 1.0, %v804_v48  ;;  %v1534_v62 = vand.u32 2147483648, %v2845_v42  ;;  %v2881_v21 = vadd.f32 1.0, %v2238_v41  ;;  %2249 = vpow2.f32 %v2145_v2 }
  0xc0   :  { %v1045_v61 = vsub.f32 1.0, %v1044_v51  ;;  %v2244_v24 = vpop.eup %2243  ;;  %vm809_vm9 = vweird.f32 %v2240_v27  ;;  %vm1528_vm10 = vweird.f32 %v2845_v42  ;;  %2251 = vrcp.f32 %v2877_v46 }
  0xc1   :  { %v806_v0 = vmul.f32 %v2240_v27, %v805_v56  ;;  %v2246_v1 = vpop.eup %2245  ;;  %vm1049_vm11 = vweird.f32 %v2242_v45  ;;  %v1284_v4 = vmul.f32 %v2244_v24, %v2843_v35  ;;  %vm2886_vm12 = vcmp.eq.f32.partialorder %v1292_v28, 8.507059e+37  ;;  %vm810_vm14 = vmor %vm808_vm3, %vm809_vm9 }
  0xc2   :  { %v1046_v36 = vmul.f32 %v2242_v45, %v1045_v61  ;;  %v2248_v10 = vpop.eup %2247  ;;  %v1295_v12 = vor.u32 1.1754944e-38, %v1294_v57  ;;  %v1524_v37 = vmul.f32 %v2246_v1, %v2845_v42  ;;  %vm2891_vm13 = vcmp.eq.f32.partialorder %v1532_v60, 8.507059e+37  ;;  %vm1050_vm15 = vmor %vm1048_vm4, %vm1049_vm11 }
  0xc3   :  { %v807_v11 = vadd.f32 %v2240_v27, %v806_v0  ;;  %v1285_v15 = vsub.f32 1.0, %v1284_v4  ;;  %v1535_v18 = vor.u32 1.1754944e-38, %v1534_v62  ;;  %2253 = vrcp.f32 %v2881_v21 }
  0xc4   :  { %v1047_v3 = vadd.f32 %v2242_v45, %v1046_v36  ;;  %vm1289_vm0 = vweird.f32 %v2244_v24  ;;  %v1525_v20 = vsub.f32 1.0, %v1524_v37  ;;  %v827_v22 = vand.u32 2147483647, %v2877_v46 }
  0xc5   :  { %v811_v5 = vsel %vm810_vm14, %v2240_v27, %v807_v11  ;;  %v2250_v23 = vpop.eup %2249  ;;  %v1286_v16 = vmul.f32 %v2244_v24, %v1285_v15  ;;  %v829_v29 = vand.u32 2147483648, %v2877_v46  ;;  %vm1529_vm1 = vweird.f32 %v2246_v1  ;;  %vm1290_vm2 = vmor %vm1288_vm8, %vm1289_vm0  ;;  %v369_v15 = vpop.f32.mrf.mxu0 }
  0xc6   :  { %v816_v25 = vsel %vm2862_vm5, %v815_v50, %v811_v5  ;;  %v1051_v26 = vsel %vm1050_vm15, %v2242_v45, %v1047_v3  ;;  %v2252_v30 = vpop.eup %2251  ;;  %v1526_v19 = vmul.f32 %v2246_v1, %v1525_v20  ;;  %v1067_v38 = vand.u32 2147483647, %v2881_v21  ;;  %vm1530_vm3 = vmor %vm1528_vm10, %vm1529_vm1 }
  0xc7   :  { %v1735_v58 = vmul.f32 %v816_v25, %v2653_v6  ;;  %v1056_v8 = vsel %vm2867_vm7, %v1055_v53, %v1051_v26  ;;  %v1287_v14 = vadd.f32 %v2244_v24, %v1286_v16  ;;  %v819_v34 = vmul.f32 %v2252_v30, %v2877_v46  ;;  %v447_v53 = vpop.f32.mrf.mxu2 }
  0xc8   :  { %v1751_v31 = vmul.f32 %v1056_v8, %v2660_v9  ;;  %v1527_v43 = vadd.f32 %v2246_v1, %v1526_v19  ;;  %v1069_v6 = vand.u32 2147483648, %v2881_v21  ;;  %v2914_v41 = vadd.f32 1.0, %v2248_v10 }
  0xc9   :  { %v1799_v39 = vpack.c.bf16 %v1735_v58, %v1735_v58  ;;  %v2254_v27 = vpop.eup %2253  ;;  %v1291_v45 = vsel %vm1290_vm2, %v2244_v24, %v1287_v14  ;;  %v820_v9 = vsub.f32 1.0, %v819_v34  ;;  %v2918_v48 = vadd.f32 1.0, %v2250_v23 }
  0xca   :  { %v1815_v2 = vpack.c.bf16 %v1751_v31, %v1751_v31  ;;  %v1296_v35 = vsel %vm2886_vm12, %v1295_v12, %v1291_v45  ;;  %v1531_v49 = vsel %vm1530_vm3, %v2246_v1, %v1527_v43  ;;  %vm824_vm4 = vweird.f32 %v2252_v30 }
  0xcb   :  { %1864 = vst.msk [vmem:[%s4089_s3 + $0x8] sm:$0xf] %vm1861_vm6, %v1799_v39  ;;  %v1059_v50 = vmul.f32 %v2254_v27, %v2881_v21  ;;  %v1767_v42 = vmul.f32 %v1296_v35, %v2716_v59  ;;  %v1536_v51 = vsel %vm2891_vm13, %v1535_v18, %v1531_v49  ;;  %v821_v52 = vmul.f32 %v2252_v30, %v820_v9  ;;  %v409_v18 = vpop.f32.mrf.mxu1 }
  0xcc   :  { %1880 = vst.msk [vmem:[%s4089_s3 + $0x48] sm:$0xf] %vm1861_vm6, %v1815_v2  ;;  %2255 = vrcp.f32 %v2914_v41  ;;  %v1783_v28 = vmul.f32 %v1536_v51, %v2791_v54  ;;  %vm823_vm5 = vweird.f32 %v2877_v46  ;;  %v2938_v57 = vadd.f32 %v2607_v33, %v407_v44 }
  0xcd   :  { %v1060_v56 = vsub.f32 1.0, %v1059_v50  ;;  %v1831_v60 = vpack.c.bf16 %v1767_v42, %v1767_v42  ;;  %v822_v61 = vadd.f32 %v2252_v30, %v821_v52  ;;  %vm828_vm7 = vcmp.eq.f32.partialorder %v827_v22, 8.507059e+37  ;;  %vm825_vm8 = vmor %vm823_vm5, %vm824_vm4 }
  0xce   :  { %2257 = vrcp.f32 %v2918_v48  ;;  %v1847_v59 = vpack.c.bf16 %v1783_v28, %v1783_v28  ;;  %v830_v62 = vor.u32 1.1754944e-38, %v829_v29  ;;  %vm1064_vm9 = vweird.f32 %v2254_v27 }
  0xcf   :  { %v1061_v24 = vmul.f32 %v2254_v27, %v1060_v56  ;;  %1896 = vst.msk [vmem:[%s4089_s3 + $0x88] sm:$0xf] %vm1861_vm6, %v1831_v60  ;;  %v826_v54 = vsel %vm825_vm8, %v2252_v30, %v822_v61  ;;  %vm1063_vm10 = vweird.f32 %v2881_v21  ;;  %vm2947_vm11 = vcmp.eq.f32.partialorder %v1067_v38, 8.507059e+37 }
  0xd0   :  { %v1070_v0 = vor.u32 1.1754944e-38, %v1069_v6  ;;  %1912 = vst.msk [vmem:[%s4089_s3 + $0xc8] sm:$0xf] %vm1861_vm6, %v1847_v59  ;;  %v831_v1 = vsel %vm828_vm7, %v830_v62, %v826_v54  ;;  %vm1303_vm12 = vweird.f32 %v2914_v41  ;;  %2259 = vpow2.f32 %v2873_v55  ;;  %vm1065_vm13 = vmor %vm1063_vm10, %vm1064_vm9 }
  0xd1   :  { %v1062_v36 = vadd.f32 %v2254_v27, %v1061_v24  ;;  %v2114_v4 = vmul.f32 -1.442695, %v2938_v57  ;;  %v1736_v10 = vmul.f32 %v831_v1, %v2798_v63  ;;  %v1307_v11 = vand.u32 2147483647, %v2914_v41 }
  0xd2   :  { %v2256_v21 = vpop.eup %2255  ;;  %v1309_v12 = vand.u32 2147483648, %v2914_v41  ;;  %v2963_v37 = vadd.f32 %v2607_v33, %v447_v53  ;;  %v1547_v55 = vand.u32 2147483647, %v2918_v48  ;;  %v2971_v23 = vadd.f32 %v2607_v33, %v487_v7  ;;  %v489_v53 = vpop.f32.mrf.mxu3 }
  0xd3   :  { %v1066_v13 = vsel %vm1065_vm13, %v2254_v27, %v1062_v36  ;;  %v1299_v3 = vmul.f32 %v2256_v21, %v2914_v41  ;;  %2261 = vpow2.f32 %v2114_v4  ;;  %v1800_v20 = vpack.c.bf16 %v1736_v10, %v1736_v10 }
  0xd4   :  { %v2258_v5 = vpop.eup %2257  ;;  %v1071_v63 = vsel %vm2947_vm11, %v1070_v0, %v1066_v13  ;;  %v2130_v22 = vmul.f32 -1.442695, %v2963_v37  ;;  %v1549_v29 = vand.u32 2147483648, %v2918_v48  ;;  %v2146_v30 = vmul.f32 -1.442695, %v2971_v23 }
  0xd5   :  { %v1752_v25 = vmul.f32 %v1071_v63, %v2805_v47  ;;  %v1300_v26 = vsub.f32 1.0, %v1299_v3  ;;  %v1539_v16 = vmul.f32 %v2258_v5, %v2918_v48  ;;  %1865 = vst.msk [vmem:[%s4089_s3 + $0xc] sm:$0xf] %vm1861_vm6, %v1800_v20  ;;  %v2982_v58 = vadd.f32 %v2607_v33, %v369_v15  ;;  %v449_v47 = vpop.f32.mrf.mxu2 }
  0xd6   :  { %2263 = vpow2.f32 %v2130_v22  ;;  %v2985_v8 = vadd.f32 %v2607_v33, %v409_v18  ;;  %v2260_v19 = vpop.eup %2259  ;;  %vm1304_vm14 = vweird.f32 %v2256_v21  ;;  %vm1544_vm15 = vweird.f32 %v2258_v5 }
  0xd7   :  { %v1816_v31 = vpack.c.bf16 %v1752_v25, %v1752_v25  ;;  %v1301_v14 = vmul.f32 %v2256_v21, %v1300_v26  ;;  %v1540_v34 = vsub.f32 1.0, %v1539_v16  ;;  %v2987_v38 = vadd.f32 1.0, %v2260_v19  ;;  %vm1305_vm0 = vmor %vm1303_vm12, %vm1304_vm14 }
  0xd8   :  { %2265 = vpow2.f32 %v2146_v30  ;;  %v2099_v39 = vmul.f32 -1.442695, %v2982_v58  ;;  %v2115_v43 = vmul.f32 -1.442695, %v2985_v8  ;;  %v2996_v2 = vadd.f32 %v2607_v33, %v449_v47 }
  0xd9   :  { %v2262_v6 = vpop.eup %2261  ;;  %1881 = vst.msk [vmem:[%s4089_s3 + $0x4c] sm:$0xf] %vm1861_vm6, %v1816_v31  ;;  %v1302_v44 = vadd.f32 %v2256_v21, %v1301_v14  ;;  %v1541_v27 = vmul.f32 %v2258_v5, %v1540_v34  ;;  %vm1308_vm1 = vcmp.eq.f32.partialorder %v1307_v11, 8.507059e+37  ;;  %v1310_v45 = vor.u32 1.1754944e-38, %v1309_v12 }
  0xda   :  { %vm1543_vm2 = vweird.f32 %v2918_v48  ;;  %2267 = vrcp.f32 %v2987_v38  ;;  %v3002_v49 = vadd.f32 1.0, %v2262_v6  ;;  %vm1548_vm4 = vcmp.eq.f32.partialorder %v1547_v55, 8.507059e+37  ;;  %v492_v15 = vpop.f32.mrf.mxu3 }
  0xdb   :  { %v1306_v9 = vsel %vm1305_vm0, %v2256_v21, %v1302_v44  ;;  %v1542_v35 = vadd.f32 %v2258_v5, %v1541_v27  ;;  %2269 = vpow2.f32 %v2099_v39  ;;  %vm1545_vm3 = vmor %vm1543_vm2, %vm1544_vm15  ;;  %v1550_v51 = vor.u32 1.1754944e-38, %v1549_v29 }
  0xdc   :  { %v2264_v50 = vpop.eup %2263  ;;  %v1311_v42 = vsel %vm1308_vm1, %v1310_v45, %v1306_v9  ;;  %2271 = vpow2.f32 %v2115_v43  ;;  %v2131_v48 = vmul.f32 -1.442695, %v2996_v2  ;;  %v842_v60 = vand.u32 2147483647, %v2987_v38 }
  0xdd   :  { %v1768_v41 = vmul.f32 %v1311_v42, %v2823_v17  ;;  %v1546_v52 = vsel %vm1545_vm3, %v2258_v5, %v1542_v35  ;;  %2273 = vrcp.f32 %v3002_v49  ;;  %v844_v61 = vand.u32 2147483648, %v2987_v38 }
  0xde   :  { %v2266_v28 = vpop.eup %2265  ;;  %v1551_v56 = vsel %vm1548_vm4, %v1550_v51, %v1546_v52  ;;  %v3009_v59 = vadd.f32 1.0, %v2264_v50  ;;  %v1082_v46 = vand.u32 2147483647, %v3002_v49  ;;  %v1084_v0 = vand.u32 2147483648, %v3002_v49 }
  0xdf   :  { %v1832_v62 = vpack.c.bf16 %v1768_v41, %v1768_v41  ;;  %v1784_v24 = vmul.f32 %v1551_v56, %v2835_v32  ;;  %v3012_v54 = vadd.f32 1.0, %v2266_v28  ;;  %v3018_v1 = vadd.f32 %v2607_v33, %v489_v53 }
  0xe0   :  { %v2268_v17 = vpop.eup %2267  ;;  %2275 = vrcp.f32 %v3009_v59  ;;  %vm838_vm5 = vweird.f32 %v2987_v38  ;;  %vm3026_vm7 = vcmp.eq.f32.partialorder %v842_v60, 8.507059e+37  ;;  %v845_v10 = vor.u32 1.1754944e-38, %v844_v61  ;;  %v372_v61 = vpop.f32.mrf.mxu0 }
  0xe1   :  { %v2270_v36 = vpop.eup %2269  ;;  %1897 = vst.msk [vmem:[%s4089_s3 + $0x8c] sm:$0xf] %vm1861_vm6, %v1832_v62  ;;  %v1848_v4 = vpack.c.bf16 %v1784_v24, %v1784_v24  ;;  %v834_v32 = vmul.f32 %v2268_v17, %v2987_v38  ;;  %2277 = vpow2.f32 %v2131_v48  ;;  %v1322_v33 = vand.u32 2147483647, %v3009_v59 }
  0xe2   :  { %v2272_v7 = vpop.eup %2271  ;;  %2279 = vrcp.f32 %v3012_v54  ;;  %vm1078_vm8 = vweird.f32 %v3002_v49  ;;  %v1324_v13 = vand.u32 2147483648, %v3009_v59  ;;  %v3038_v3 = vadd.f32 1.0, %v2270_v36 }
  0xe3   :  { %v2274_v11 = vpop.eup %2273  ;;  %1913 = vst.msk [vmem:[%s4089_s3 + $0xcc] sm:$0xf] %vm1861_vm6, %v1848_v4  ;;  %v835_v12 = vsub.f32 1.0, %v834_v32  ;;  %vm3041_vm9 = vcmp.eq.f32.partialorder %v1082_v46, 8.507059e+37  ;;  %v1085_v18 = vor.u32 1.1754944e-38, %v1084_v0  ;;  %v1564_v5 = vand.u32 2147483648, %v3012_v54  ;;  %v452_v46 = vpop.f32.mrf.mxu2 }
  0xe4   :  { %v1074_v55 = vmul.f32 %v2274_v11, %v3002_v49  ;;  %vm839_vm10 = vweird.f32 %v2268_v17  ;;  %v1562_v63 = vand.u32 2147483647, %v3012_v54  ;;  %2281 = vrcp.f32 %v3038_v3 }
  0xe5   :  { %v836_v20 = vmul.f32 %v2268_v17, %v835_v12  ;;  %vm1318_vm11 = vweird.f32 %v3009_v59  ;;  %v859_v26 = vand.u32 2147483648, %v3038_v3  ;;  %v3050_v16 = vadd.f32 1.0, %v2272_v7  ;;  %vm840_vm15 = vmor %vm838_vm5, %vm839_vm10 }
  0xe6   :  { %v2276_v22 = vpop.eup %2275  ;;  %v1075_v25 = vsub.f32 1.0, %v1074_v55  ;;  %vm1079_vm12 = vweird.f32 %v2274_v11  ;;  %vm3053_vm13 = vcmp.eq.f32.partialorder %v1322_v33, 8.507059e+37  ;;  %v1325_v31 = vor.u32 1.1754944e-38, %v1324_v13 }
  0xe7   :  { %v2278_v29 = vpop.eup %2277  ;;  %v837_v30 = vadd.f32 %v2268_v17, %v836_v20  ;;  %v1314_v47 = vmul.f32 %v2276_v22, %v3009_v59  ;;  %vm1558_vm14 = vweird.f32 %v3012_v54  ;;  %v1565_v39 = vor.u32 1.1754944e-38, %v1564_v5  ;;  %vm1080_vm3 = vmor %vm1078_vm8, %vm1079_vm12 }
  0xe8   :  { %v2280_v14 = vpop.eup %2279  ;;  %v1076_v34 = vmul.f32 %v2274_v11, %v1075_v25  ;;  %v857_v43 = vand.u32 2147483647, %v3038_v3  ;;  %2283 = vrcp.f32 %v3050_v16  ;;  %vm1319_vm0 = vweird.f32 %v2276_v22 }
  0xe9   :  { %v841_v6 = vsel %vm840_vm15, %v2268_v17, %v837_v30  ;;  %v1315_v44 = vsub.f32 1.0, %v1314_v47  ;;  %v1554_v27 = vmul.f32 %v2280_v14, %v3012_v54  ;;  %vm3064_vm1 = vcmp.eq.f32.partialorder %v1562_v63, 8.507059e+37  ;;  %v412_v17 = vpop.f32.mrf.mxu1  ;;  %v3124_v30 = vld [vmem:[%s4088_s2] ss:$0 sm:$0xff] }
  0xea   :  { %v846_v9 = vsel %vm3026_vm7, %v845_v10, %v841_v6  ;;  %v1077_v38 = vadd.f32 %v2274_v11, %v1076_v34  ;;  %vm853_vm2 = vweird.f32 %v3038_v3  ;;  %v860_v35 = vor.u32 1.1754944e-38, %v859_v26  ;;  %v2282_v42 = vpop.eup %2281  ;;  %vm1320_vm7 = vmor %vm1318_vm11, %vm1319_vm0 }
  0xeb   :  { %v3071_v50 = vadd.f32 1.0, %v2278_v29  ;;  %v1737_v51 = vmul.f32 %v846_v9, %v2850_v40  ;;  %v1316_v41 = vmul.f32 %v2276_v22, %v1315_v44  ;;  %v1555_v52 = vsub.f32 1.0, %v1554_v27  ;;  %v454_v45 = vpop.f32.mrf.mxu2 }
  0xec   :  { %vm1559_vm4 = vweird.f32 %v2280_v14  ;;  %v1081_v48 = vsel %vm1080_vm3, %v2274_v11, %v1077_v38  ;;  %v849_v53 = vmul.f32 %v2282_v42, %v3038_v3  ;;  %vm3078_vm5 = vcmp.eq.f32.partialorder %v857_v43, 8.507059e+37  ;;  %v374_v43 = vpop.f32.mrf.mxu0 }
  0xed   :  { %v1097_v56 = vand.u32 2147483647, %v3050_v16  ;;  %v1099_v60 = vand.u32 2147483648, %v3050_v16  ;;  %v1801_v40 = vpack.c.bf16 %v1737_v51, %v1737_v51  ;;  %v1086_v49 = vsel %vm3041_vm9, %v1085_v18, %v1081_v48  ;;  %vm1560_vm10 = vmor %vm1558_vm14, %vm1559_vm4 }
  0xee   :  { %v1317_v62 = vadd.f32 %v2276_v22, %v1316_v41  ;;  %v1556_v24 = vmul.f32 %v2280_v14, %v1555_v52  ;;  %v2284_v0 = vpop.eup %2283  ;;  %v1753_v36 = vmul.f32 %v1086_v49, %v2938_v57  ;;  %v850_v4 = vsub.f32 1.0, %v849_v53 }
  0xef   :  { %vm1093_vm8 = vweird.f32 %v3050_v16  ;;  %2285 = vrcp.f32 %v3071_v50  ;;  %1866 = vst.msk [vmem:[%s4089_s3 + $0x10] sm:$0xf] %vm1861_vm6, %v1801_v40  ;;  %vm854_vm9 = vweird.f32 %v2282_v42  ;;  %v1089_v21 = vmul.f32 %v2284_v0, %v3050_v16  ;;  %v494_v40 = vpop.f32.mrf.mxu3 }
  0xf0   :  { %v1321_v32 = vsel %vm1320_vm7, %v2276_v22, %v1317_v62  ;;  %v1557_v7 = vadd.f32 %v2280_v14, %v1556_v24  ;;  %v1817_v57 = vpack.c.bf16 %v1753_v36, %v1753_v36  ;;  %v851_v10 = vmul.f32 %v2282_v42, %v850_v4 }
  0xf1   :  { %v1326_v59 = vsel %vm3053_vm13, %v1325_v31, %v1321_v32  ;;  %vm3102_vm11 = vcmp.eq.f32.partialorder %v1097_v56, 8.507059e+37  ;;  %v1090_v13 = vsub.f32 1.0, %v1089_v21  ;;  %v1100_v55 = vor.u32 1.1754944e-38, %v1099_v60  ;;  %vm855_vm13 = vmor %vm853_vm2, %vm854_vm9  ;;  %v414_v27 = vpop.f32.mrf.mxu1 }
  0xf2   :  { %v1769_v11 = vmul.f32 %v1326_v59, %v2963_v37  ;;  %v1561_v12 = vsel %vm1560_vm10, %v2280_v14, %v1557_v7  ;;  %1882 = vst.msk [vmem:[%s4089_s3 + $0x50] sm:$0xf] %vm1861_vm6, %v1817_v57  ;;  %v852_v18 = vadd.f32 %v2282_v42, %v851_v10  ;;  %vm1094_vm12 = vweird.f32 %v2284_v0 }
  0xf3   :  { %v1566_v54 = vsel %vm3064_vm1, %v1565_v39, %v1561_v12  ;;  %v2147_v5 = vmul.f32 -1.442695, %v3018_v1  ;;  %v1091_v37 = vmul.f32 %v2284_v0, %v1090_v13  ;;  %vm1333_vm14 = vweird.f32 %v3071_v50  ;;  %vm1095_vm15 = vmor %vm1093_vm8, %vm1094_vm12 }
  0xf4   :  { %v1833_v20 = vpack.c.bf16 %v1769_v11, %v1769_v11  ;;  %v1785_v63 = vmul.f32 %v1566_v54, %v2971_v23  ;;  %v1337_v22 = vand.u32 2147483647, %v3071_v50  ;;  %v856_v26 = vsel %vm855_vm13, %v2282_v42, %v852_v18  ;;  %v377_v13 = vpop.f32.mrf.mxu0 }
  0xf5   :  { %v2286_v25 = vpop.eup %2285  ;;  %v1339_v29 = vand.u32 2147483648, %v3071_v50  ;;  %2287 = vpow2.f32 %v2147_v5  ;;  %v3127_v23 = vadd.f32 %v3124_v30, %v372_v61  ;;  %v861_v47 = vsel %vm3078_vm5, %v860_v35, %v856_v26 }
  0xf6   :  { %1898 = vst.msk [vmem:[%s4089_s3 + $0x90] sm:$0xf] %vm1861_vm6, %v1833_v20  ;;  %v1849_v3 = vpack.c.bf16 %v1785_v63, %v1785_v63  ;;  %v1092_v19 = vadd.f32 %v2284_v0, %v1091_v37  ;;  %v1329_v31 = vmul.f32 %v2286_v25, %v3071_v50  ;;  %v1738_v14 = vmul.f32 %v861_v47, %v2982_v58 }
  0xf7   :  { %vm1334_vm0 = vweird.f32 %v2286_v25  ;;  %v2100_v34 = vmul.f32 -1.442695, %v3127_v23  ;;  %v3142_v39 = vadd.f32 %v3124_v30, %v412_v17  ;;  %v3149_v58 = vadd.f32 %v3124_v30, %v452_v46 }
  0xf8   :  { %1914 = vst.msk [vmem:[%s4089_s3 + $0xd0] sm:$0xf] %vm1861_vm6, %v1849_v3  ;;  %v1096_v6 = vsel %vm1095_vm15, %v2284_v0, %v1092_v19  ;;  %v1330_v44 = vsub.f32 1.0, %v1329_v31  ;;  %v3152_v16 = vadd.f32 %v3124_v30, %v492_v15  ;;  %v1802_v9 = vpack.c.bf16 %v1738_v14, %v1738_v14  ;;  %vm1335_vm1 = vmor %vm1333_vm14, %vm1334_vm0 }
  0xf9   :  { %v1101_v38 = vsel %vm3102_vm11, %v1100_v55, %v1096_v6  ;;  %2289 = vpow2.f32 %v2100_v34  ;;  %v2116_v35 = vmul.f32 -1.442695, %v3142_v39  ;;  %v2132_v41 = vmul.f32 -1.442695, %v3149_v58  ;;  %v417_v26 = vpop.f32.mrf.mxu1 }
  0xfa   :  { %v1754_v42 = vmul.f32 %v1101_v38, %v2985_v8  ;;  %v1331_v51 = vmul.f32 %v2286_v25, %v1330_v44  ;;  %v2148_v52 = vmul.f32 -1.442695, %v3152_v16  ;;  %1867 = vst.msk [vmem:[%s4089_s3 + $0x14] sm:$0xf] %vm1861_vm6, %v1802_v9  ;;  %v3165_v53 = vadd.f32 %v3124_v30, %v374_v43 }
  0xfb   :  { %v2288_v48 = vpop.eup %2287  ;;  %2291 = vpow2.f32 %v2116_v35  ;;  %v3168_v28 = vadd.f32 %v3124_v30, %v414_v27  ;;  %v3171_v8 = vadd.f32 %v3124_v30, %v454_v45  ;;  %v1340_v49 = vor.u32 1.1754944e-38, %v1339_v29 }
  0xfc   :  { %v1818_v56 = vpack.c.bf16 %v1754_v42, %v1754_v42  ;;  %v1332_v60 = vadd.f32 %v2286_v25, %v1331_v51  ;;  %v3173_v61 = vadd.f32 1.0, %v2288_v48  ;;  %2293 = vpow2.f32 %v2132_v41 }
  0xfd   :  { %2295 = vpow2.f32 %v2148_v52  ;;  %v2101_v62 = vmul.f32 -1.442695, %v3165_v53  ;;  %vm1338_vm2 = vcmp.eq.f32.partialorder %v1337_v22, 8.507059e+37  ;;  %v2117_v0 = vmul.f32 -1.442695, %v3168_v28 }
  0xfe   :  { %1883 = vst.msk [vmem:[%s4089_s3 + $0x54] sm:$0xf] %vm1861_vm6, %v1818_v56  ;;  %v1336_v24 = vsel %vm1335_vm1, %v2286_v25, %v1332_v60  ;;  %2297 = vrcp.f32 %v3173_v61  ;;  %v3186_v50 = vadd.f32 %v3124_v30, %v494_v40  ;;  %v2133_v32 = vmul.f32 -1.442695, %v3171_v8 }
  0xff   :  { %v2290_v17 = vpop.eup %2289  ;;  %v1341_v46 = vsel %vm1338_vm2, %v1340_v49, %v1336_v24  ;;  %2299 = vpow2.f32 %v2101_v62  ;;  %v1577_v59 = vand.u32 2147483647, %v3173_v61  ;;  %v1579_v10 = vand.u32 2147483648, %v3173_v61 }
 0x100   :  { %v1770_v36 = vmul.f32 %v1341_v46, %v2996_v2  ;;  %v3189_v4 = vadd.f32 1.0, %v2290_v17  ;;  %v2149_v2 = vmul.f32 -1.442695, %v3186_v50  ;;  %vm1573_vm3 = vweird.f32 %v3173_v61 }
 0x101   :  { %v2292_v7 = vpop.eup %2291  ;;  %vm3210_vm4 = vcmp.eq.f32.partialorder %v1577_v59, 8.507059e+37  ;;  %v3217_v63 = vadd.f32 %v3124_v30, %v377_v13  ;;  %v1580_v25 = vor.u32 1.1754944e-38, %v1579_v10  ;;  %v3236_v38 = vadd.f32 %v3124_v30, %v417_v26 }
 0x102   :  { %v2294_v21 = vpop.eup %2293  ;;  %v1834_v57 = vpack.c.bf16 %v1770_v36, %v1770_v36  ;;  %2301 = vrcp.f32 %v3189_v4  ;;  %v3195_v11 = vadd.f32 1.0, %v2292_v7  ;;  %v872_v18 = vand.u32 2147483647, %v3189_v4 }
 0x103   :  { %v2296_v33 = vpop.eup %2295  ;;  %v3197_v12 = vadd.f32 1.0, %v2294_v21  ;;  %2303 = vpow2.f32 %v2117_v0  ;;  %v874_v20 = vand.u32 2147483648, %v3189_v4  ;;  %vm868_vm5 = vweird.f32 %v3189_v4 }
 0x104   :  { %v2298_v55 = vpop.eup %2297  ;;  %1899 = vst.msk [vmem:[%s4089_s3 + $0x94] sm:$0xf] %vm1861_vm6, %v1834_v57  ;;  %v3204_v15 = vadd.f32 1.0, %v2296_v33  ;;  %2305 = vpow2.f32 %v2133_v32  ;;  %v1112_v3 = vand.u32 2147483647, %v3195_v11  ;;  %v1114_v47 = vand.u32 2147483648, %v3195_v11 }
 0x105   :  { %v1569_v54 = vmul.f32 %v2298_v55, %v3173_v61  ;;  %2307 = vrcp.f32 %v3195_v11  ;;  %v2300_v37 = vpop.eup %2299  ;;  %v1354_v19 = vand.u32 2147483648, %v3197_v12  ;;  %vm1574_vm7 = vweird.f32 %v2298_v55 }
 0x106   :  { %2309 = vrcp.f32 %v3197_v12  ;;  %vm3225_vm8 = vcmp.eq.f32.partialorder %v872_v18, 8.507059e+37  ;;  %v1352_v6 = vand.u32 2147483647, %v3197_v12  ;;  %v875_v27 = vor.u32 1.1754944e-38, %v874_v20  ;;  %vm1575_vm11 = vmor %vm1573_vm3, %vm1574_vm7 }
 0x107   :  { %v1570_v22 = vsub.f32 1.0, %v1569_v54  ;;  %2311 = vpow2.f32 %v2149_v2  ;;  %v3230_v45 = vadd.f32 1.0, %v2300_v37  ;;  %v3233_v9 = vmul.f32 -1.442695, %v3217_v63 }
 0x108   :  { %v2302_v29 = vpop.eup %2301  ;;  %2313 = vrcp.f32 %v3204_v15  ;;  %vm1108_vm9 = vweird.f32 %v3195_v11  ;;  %vm1348_vm10 = vweird.f32 %v3197_v12  ;;  %vm3244_vm13 = vcmp.eq.f32.partialorder %v1112_v3, 8.507059e+37 }
 0x109   :  { %v2304_v31 = vpop.eup %2303  ;;  %v1571_v14 = vmul.f32 %v2298_v55, %v1570_v22  ;;  %v864_v34 = vmul.f32 %v2302_v29, %v3189_v4  ;;  %vm869_vm12 = vweird.f32 %v2302_v29  ;;  %v1115_v56 = vor.u32 1.1754944e-38, %v1114_v47 }
 0x10a   :  { %v2306_v44 = vpop.eup %2305  ;;  %v1355_v60 = vor.u32 1.1754944e-38, %v1354_v19  ;;  %vm3251_vm14 = vcmp.eq.f32.partialorder %v1352_v6, 8.507059e+37  ;;  %vm1588_vm15 = vweird.f32 %v3204_v15  ;;  %v1592_v61 = vand.u32 2147483647, %v3204_v15  ;;  %vm870_vm0 = vmor %vm868_vm5, %vm869_vm12 }
 0x10b   :  { %v2308_v35 = vpop.eup %2307  ;;  %v1572_v42 = vadd.f32 %v2298_v55, %v1571_v14  ;;  %v865_v51 = vsub.f32 1.0, %v864_v34  ;;  %2315 = vrcp.f32 %v3230_v45  ;;  %v3260_v32 = vadd.f32 1.0, %v2304_v31 }
 0x10c   :  { %v2310_v41 = vpop.eup %2309  ;;  %v1104_v52 = vmul.f32 %v2308_v35, %v3195_v11  ;;  %vm1109_vm1 = vweird.f32 %v2308_v35  ;;  %v1594_v33 = vand.u32 2147483648, %v3204_v15  ;;  %v887_v5 = vand.u32 2147483647, %v3230_v45 }
 0x10d   :  { %v3248_v40 = vpop.eup %2311  ;;  %v1576_v49 = vsel %vm1575_vm11, %v2298_v55, %v1572_v42  ;;  %v866_v62 = vmul.f32 %v2302_v29, %v865_v51  ;;  %v1344_v24 = vmul.f32 %v2310_v41, %v3197_v12  ;;  %vm1349_vm2 = vweird.f32 %v2310_v41 }
 0x10e   :  { %v2314_v46 = vpop.eup %2313  ;;  %v1581_v0 = vsel %vm3210_vm4, %v1580_v25, %v1576_v49  ;;  %v1105_v36 = vsub.f32 1.0, %v1104_v52  ;;  %vm1110_vm4 = vmor %vm1108_vm9, %vm1109_vm1  ;;  %2317 = vrcp.f32 %v3260_v32  ;;  %vm3282_vm7 = vcmp.eq.f32.partialorder %v1592_v61, 8.507059e+37  ;;  %v457_v49 = vpop.f32.mrf.mxu2 }
 0x10f   :  { %v1786_v7 = vmul.f32 %v1581_v0, %v3018_v1  ;;  %v867_v21 = vadd.f32 %v2302_v29, %v866_v62  ;;  %v1345_v57 = vsub.f32 1.0, %v1344_v24  ;;  %v1584_v59 = vmul.f32 %v2314_v46, %v3204_v15  ;;  %vm1350_vm5 = vmor %vm1348_vm10, %vm1349_vm2 }
 0x110   :  { %v1106_v10 = vmul.f32 %v2308_v35, %v1105_v36  ;;  %vm1589_vm3 = vweird.f32 %v2314_v46  ;;  %v3286_v3 = vadd.f32 1.0, %v2306_v44  ;;  %v889_v34 = vand.u32 2147483648, %v3230_v45 }
 0x111   :  { %v1850_v2 = vpack.c.bf16 %v1786_v7, %v1786_v7  ;;  %v871_v13 = vsel %vm870_vm0, %v2302_v29, %v867_v21  ;;  %v1346_v55 = vmul.f32 %v2310_v41, %v1345_v57  ;;  %v1585_v54 = vsub.f32 1.0, %v1584_v59  ;;  %v2316_v22 = vpop.eup %2315  ;;  %v497_v21 = vpop.f32.mrf.mxu3 }
 0x112   :  { %v876_v1 = vsel %vm3225_vm8, %v875_v27, %v871_v13  ;;  %v1107_v18 = vadd.f32 %v2308_v35, %v1106_v10  ;;  %v1595_v29 = vor.u32 1.1754944e-38, %v1594_v33  ;;  %vm1590_vm8 = vmor %vm1588_vm15, %vm1589_vm3  ;;  %v879_v12 = vmul.f32 %v2316_v22, %v3230_v45  ;;  %v379_v57 = vpop.f32.mrf.mxu0 }
 0x113   :  { %1915 = vst.msk [vmem:[%s4089_s3 + $0xd4] sm:$0xf] %vm1861_vm6, %v1850_v2  ;;  %v1739_v4 = vmul.f32 %v876_v1, %v3127_v23  ;;  %v1347_v20 = vadd.f32 %v2310_v41, %v1346_v55  ;;  %v1586_v37 = vmul.f32 %v2314_v46, %v1585_v54  ;;  %vm883_vm9 = vweird.f32 %v3230_v45 }
 0x114   :  { %v1111_v25 = vsel %vm1110_vm4, %v2308_v35, %v1107_v18  ;;  %vm3304_vm10 = vcmp.eq.f32.partialorder %v887_v5, 8.507059e+37  ;;  %v880_v27 = vsub.f32 1.0, %v879_v12  ;;  %2319 = vrcp.f32 %v3286_v3  ;;  %v2318_v35 = vpop.eup %2317 }
 0x115   :  { %v1803_v23 = vpack.c.bf16 %v1739_v4, %v1739_v4  ;;  %v1116_v11 = vsel %vm3244_vm13, %v1115_v56, %v1111_v25  ;;  %v1351_v47 = vsel %vm1350_vm5, %v2310_v41, %v1347_v20  ;;  %v1587_v19 = vadd.f32 %v2314_v46, %v1586_v37  ;;  %v419_v37 = vpop.f32.mrf.mxu1 }
 0x116   :  { %v1755_v31 = vmul.f32 %v1116_v11, %v3142_v39  ;;  %v1356_v14 = vsel %vm3251_vm14, %v1355_v60, %v1351_v47  ;;  %v1129_v41 = vand.u32 2147483648, %v3260_v32  ;;  %v881_v52 = vmul.f32 %v2316_v22, %v880_v27 }
 0x117   :  { %1868 = vst.msk [vmem:[%s4089_s3 + $0x18] sm:$0xf] %vm1861_vm6, %v1803_v23  ;;  %v1771_v43 = vmul.f32 %v1356_v14, %v3149_v58  ;;  %v1591_v6 = vsel %vm1590_vm8, %v2314_v46, %v1587_v19  ;;  %v1127_v58 = vand.u32 2147483647, %v3260_v32  ;;  %vm884_vm11 = vweird.f32 %v2316_v22 }
 0x118   :  { %v1819_v15 = vpack.c.bf16 %v1755_v31, %v1755_v31  ;;  %v1596_v44 = vsel %vm3282_vm7, %v1595_v29, %v1591_v6  ;;  %v890_v48 = vor.u32 1.1754944e-38, %v889_v34  ;;  %v1119_v56 = vmul.f32 %v2318_v35, %v3260_v32  ;;  %vm885_vm13 = vmor %vm883_vm9, %vm884_vm11 }
 0x119   :  { %v1835_v42 = vpack.c.bf16 %v1771_v43, %v1771_v43  ;;  %v1787_v51 = vmul.f32 %v1596_v44, %v3152_v16  ;;  %vm1123_vm12 = vweird.f32 %v3260_v32  ;;  %v3325_v60 = vadd.f32 1.0, %v3248_v40  ;;  %v499_v40 = vpop.f32.mrf.mxu3 }
 0x11a   :  { %1884 = vst.msk [vmem:[%s4089_s3 + $0x58] sm:$0xf] %vm1861_vm6, %v1819_v15  ;;  %2321 = vpow2.f32 %v3233_v9  ;;  %v882_v62 = vadd.f32 %v2316_v22, %v881_v52  ;;  %v1120_v24 = vsub.f32 1.0, %v1119_v56  ;;  %v1367_v17 = vand.u32 2147483647, %v3286_v3  ;;  %v2320_v46 = vpop.eup %2319 }
 0x11b   :  { %1900 = vst.msk [vmem:[%s4089_s3 + $0x98] sm:$0xf] %vm1861_vm6, %v1835_v42  ;;  %v1851_v16 = vpack.c.bf16 %v1787_v51, %v1787_v51  ;;  %v2118_v61 = vmul.f32 -1.442695, %v3236_v38  ;;  %vm1124_vm14 = vweird.f32 %v2318_v35  ;;  %vm3336_vm15 = vcmp.eq.f32.partialorder %v1127_v58, 8.507059e+37 }
 0x11c   :  { %v1130_v9 = vor.u32 1.1754944e-38, %v1129_v41  ;;  %2323 = vrcp.f32 %v3325_v60  ;;  %v886_v0 = vsel %vm885_vm13, %v2316_v22, %v882_v62  ;;  %v1121_v36 = vmul.f32 %v2318_v35, %v1120_v24  ;;  %vm1125_vm2 = vmor %vm1123_vm12, %vm1124_vm14 }
 0x11d   :  { %1916 = vst.msk [vmem:[%s4089_s3 + $0xd8] sm:$0xf] %vm1861_vm6, %v1851_v16  ;;  %2325 = vpow2.f32 %v2118_v61  ;;  %v3342_v7 = vadd.f32 %v3124_v30, %v457_v49  ;;  %v891_v45 = vsel %vm3304_vm10, %v890_v48, %v886_v0  ;;  %v1359_v59 = vmul.f32 %v2320_v46, %v3286_v3  ;;  %v459_v16 = vpop.f32.mrf.mxu2 }
 0x11e   :  { %vm1363_vm0 = vweird.f32 %v3286_v3  ;;  %v1369_v10 = vand.u32 2147483648, %v3286_v3  ;;  %v1740_v33 = vmul.f32 %v891_v45, %v3165_v53  ;;  %v1122_v2 = vadd.f32 %v2318_v35, %v1121_v36 }
 0x11f   :  { %vm3350_vm1 = vcmp.eq.f32.partialorder %v1367_v17, 8.507059e+37  ;;  %v2134_v55 = vmul.f32 -1.442695, %v3342_v7  ;;  %v1360_v1 = vsub.f32 1.0, %v1359_v59  ;;  %vm1364_vm3 = vweird.f32 %v2320_v46 }
 0x120   :  { %v2322_v54 = vpop.eup %2321  ;;  %v3359_v18 = vadd.f32 %v3124_v30, %v497_v21  ;;  %v3362_v5 = vadd.f32 %v3124_v30, %v379_v57  ;;  %v1804_v53 = vpack.c.bf16 %v1740_v33, %v1740_v33  ;;  %v1126_v4 = vsel %vm1125_vm2, %v2318_v35, %v1122_v2  ;;  %vm1365_vm4 = vmor %vm1363_vm0, %vm1364_vm3 }
 0x121   :  { %v3364_v20 = vadd.f32 1.0, %v2322_v54  ;;  %2327 = vpow2.f32 %v2134_v55  ;;  %v1131_v25 = vsel %vm3336_vm15, %v1130_v9, %v1126_v4  ;;  %v1361_v32 = vmul.f32 %v2320_v46, %v1360_v1 }
 0x122   :  { %v2324_v22 = vpop.eup %2323  ;;  %v2150_v26 = vmul.f32 -1.442695, %v3359_v18  ;;  %v2103_v29 = vmul.f32 -1.442695, %v3362_v5  ;;  %1869 = vst.msk [vmem:[%s4089_s3 + $0x1c] sm:$0xf] %vm1861_vm6, %v1804_v53  ;;  %v1756_v11 = vmul.f32 %v1131_v25, %v3168_v28  ;;  %v3380_v34 = vadd.f32 %v3124_v30, %v419_v37 }
 0x123   :  { %v2326_v23 = vpop.eup %2325  ;;  %v1370_v47 = vor.u32 1.1754944e-38, %v1369_v10  ;;  %v1599_v19 = vmul.f32 %v2324_v22, %v3325_v60  ;;  %2329 = vrcp.f32 %v3364_v20  ;;  %v1362_v31 = vadd.f32 %v2320_v46, %v1361_v32 }
 0x124   :  { %v1607_v14 = vand.u32 2147483647, %v3325_v60  ;;  %v1609_v12 = vand.u32 2147483648, %v3325_v60  ;;  %v1820_v43 = vpack.c.bf16 %v1756_v11, %v1756_v11  ;;  %v3385_v28 = vadd.f32 1.0, %v2326_v23  ;;  %v382_v11 = vpop.f32.mrf.mxu0 }
 0x125   :  { %v1600_v6 = vsub.f32 1.0, %v1599_v19  ;;  %2331 = vpow2.f32 %v2150_v26  ;;  %v1366_v39 = vsel %vm1365_vm4, %v2320_v46, %v1362_v31  ;;  %v902_v15 = vand.u32 2147483647, %v3364_v20 }
 0x126   :  { %v904_v44 = vand.u32 2147483648, %v3364_v20  ;;  %2333 = vpow2.f32 %v2103_v29  ;;  %1885 = vst.msk [vmem:[%s4089_s3 + $0x5c] sm:$0xf] %vm1861_vm6, %v1820_v43  ;;  %v1371_v3 = vsel %vm3350_vm1, %v1370_v47, %v1366_v39  ;;  %vm1604_vm5 = vweird.f32 %v2324_v22 }
 0x127   :  { %v2328_v27 = vpop.eup %2327  ;;  %v1601_v35 = vmul.f32 %v2324_v22, %v1600_v6  ;;  %2335 = vrcp.f32 %v3385_v28  ;;  %v1772_v42 = vmul.f32 %v1371_v3, %v3171_v8  ;;  %vm1603_vm7 = vweird.f32 %v3325_v60 }
 0x128   :  { %vm3398_vm8 = vcmp.eq.f32.partialorder %v1607_v14, 8.507059e+37  ;;  %v3402_v58 = vadd.f32 1.0, %v2328_v27  ;;  %v1610_v48 = vor.u32 1.1754944e-38, %v1609_v12  ;;  %vm898_vm9 = vweird.f32 %v3364_v20  ;;  %vm1605_vm10 = vmor %vm1603_vm7, %vm1604_vm5 }
 0x129   :  { %v2330_v41 = vpop.eup %2329  ;;  %v1602_v52 = vadd.f32 %v2324_v22, %v1601_v35  ;;  %v2119_v56 = vmul.f32 -1.442695, %v3380_v34  ;;  %v1836_v49 = vpack.c.bf16 %v1772_v42, %v1772_v42  ;;  %vm3407_vm11 = vcmp.eq.f32.partialorder %v902_v15, 8.507059e+37 }
 0x12a   :  { %v894_v8 = vmul.f32 %v2330_v41, %v3364_v20  ;;  %v905_v62 = vor.u32 1.1754944e-38, %v904_v44  ;;  %vm1138_vm12 = vweird.f32 %v3385_v28  ;;  %v1142_v61 = vand.u32 2147483647, %v3385_v28 }
 0x12b   :  { %v2332_v24 = vpop.eup %2331  ;;  %v1606_v17 = vsel %vm1605_vm10, %v2324_v22, %v1602_v52  ;;  %2337 = vrcp.f32 %v3402_v58  ;;  %1901 = vst.msk [vmem:[%s4089_s3 + $0x9c] sm:$0xf] %vm1861_vm6, %v1836_v49  ;;  %v1144_v36 = vand.u32 2147483648, %v3385_v28  ;;  %v3422_v21 = vadd.f32 %v3124_v30, %v459_v16 }
 0x12c   :  { %v2334_v9 = vpop.eup %2333  ;;  %v1611_v46 = vsel %vm3398_vm8, %v1610_v48, %v1606_v17  ;;  %v895_v0 = vsub.f32 1.0, %v894_v8  ;;  %v3425_v59 = vadd.f32 1.0, %v2332_v24  ;;  %2339 = vpow2.f32 %v2119_v56  ;;  %v422_v17 = vpop.f32.mrf.mxu1 }
 0x12d   :  { %v2336_v57 = vpop.eup %2335  ;;  %v1788_v45 = vmul.f32 %v1611_v46, %v3186_v50  ;;  %v3427_v10 = vadd.f32 1.0, %v2334_v9  ;;  %vm899_vm13 = vweird.f32 %v2330_v41  ;;  %v3431_v13 = vadd.f32 %v3124_v30, %v499_v40  ;;  %v462_v46 = vpop.f32.mrf.mxu2 }
 0x12e   :  { %v896_v33 = vmul.f32 %v2330_v41, %v895_v0  ;;  %v1134_v2 = vmul.f32 %v2336_v57, %v3385_v28  ;;  %v1382_v54 = vand.u32 2147483647, %v3402_v58  ;;  %v1384_v1 = vand.u32 2147483648, %v3402_v58  ;;  %vm900_vm15 = vmor %vm898_vm9, %vm899_vm13  ;;  %v502_v0 = vpop.f32.mrf.mxu3 }
 0x12f   :  { %v1852_v55 = vpack.c.bf16 %v1788_v45, %v1788_v45  ;;  %2341 = vrcp.f32 %v3425_v59  ;;  %vm3436_vm14 = vcmp.eq.f32.partialorder %v1142_v61, 8.507059e+37  ;;  %v1145_v37 = vor.u32 1.1754944e-38, %v1144_v36 }
 0x130   :  { %v897_v50 = vadd.f32 %v2330_v41, %v896_v33  ;;  %v1135_v53 = vsub.f32 1.0, %v1134_v2  ;;  %vm1139_vm0 = vweird.f32 %v2336_v57  ;;  %vm1378_vm1 = vweird.f32 %v3402_v58 }
 0x131   :  { %v2338_v22 = vpop.eup %2337  ;;  %1917 = vst.msk [vmem:[%s4089_s3 + $0xdc] sm:$0xf] %vm1861_vm6, %v1852_v55  ;;  %v1624_v25 = vand.u32 2147483648, %v3425_v59  ;;  %2343 = vrcp.f32 %v3427_v10  ;;  %v1622_v23 = vand.u32 2147483647, %v3425_v59  ;;  %vm3453_vm2 = vcmp.eq.f32.partialorder %v1382_v54, 8.507059e+37  ;;  %vm1140_vm4 = vmor %vm1138_vm12, %vm1139_vm0  ;;  %v384_v55 = vpop.f32.mrf.mxu0 }
 0x132   :  { %v901_v32 = vsel %vm900_vm15, %v2330_v41, %v897_v50  ;;  %v1136_v26 = vmul.f32 %v2336_v57, %v1135_v53  ;;  %v1374_v29 = vmul.f32 %v2338_v22, %v3402_v58  ;;  %v2340_v47 = vpop.eup %2339  ;;  %v1385_v31 = vor.u32 1.1754944e-38, %v1384_v1 }
 0x133   :  { %v906_v19 = vsel %vm3407_vm11, %v905_v62, %v901_v32  ;;  %v917_v14 = vand.u32 2147483647, %v3427_v10  ;;  %vm1618_vm3 = vweird.f32 %v3425_v59  ;;  %v919_v39 = vand.u32 2147483648, %v3427_v10 }
 0x134   :  { %v1741_v12 = vmul.f32 %v906_v19, %v3217_v63  ;;  %v1137_v43 = vadd.f32 %v2336_v57, %v1136_v26  ;;  %v1375_v6 = vsub.f32 1.0, %v1374_v29  ;;  %vm1379_vm5 = vweird.f32 %v2338_v22 }
 0x135   :  { %v2342_v15 = vpop.eup %2341  ;;  %v1625_v44 = vor.u32 1.1754944e-38, %v1624_v25  ;;  %v3464_v27 = vadd.f32 1.0, %v2340_v47  ;;  %v2135_v3 = vmul.f32 -1.442695, %v3422_v21  ;;  %vm3468_vm7 = vcmp.eq.f32.partialorder %v1622_v23, 8.507059e+37  ;;  %vm1380_vm9 = vmor %vm1378_vm1, %vm1379_vm5 }
 0x136   :  { %v1805_v35 = vpack.c.bf16 %v1741_v12, %v1741_v12  ;;  %v1141_v42 = vsel %vm1140_vm4, %v2336_v57, %v1137_v43  ;;  %v1376_v63 = vmul.f32 %v2338_v22, %v1375_v6  ;;  %v1614_v51 = vmul.f32 %v2342_v15, %v3425_v59 }
 0x137   :  { %vm913_vm8 = vweird.f32 %v3427_v10  ;;  %v2344_v52 = vpop.eup %2343  ;;  %v1146_v28 = vsel %vm3436_vm14, %v1145_v37, %v1141_v42  ;;  %2345 = vrcp.f32 %v3464_v27  ;;  %v2151_v48 = vmul.f32 -1.442695, %v3431_v13 }
 0x138   :  { %v3478_v56 = vadd.f32 %v3124_v30, %v382_v11  ;;  %1870 = vst.msk [vmem:[%s4089_s3 + $0x20] sm:$0xf] %vm1861_vm6, %v1805_v35  ;;  %v1757_v16 = vmul.f32 %v1146_v28, %v3236_v38  ;;  %v1377_v49 = vadd.f32 %v2338_v22, %v1376_v63  ;;  %v1615_v8 = vsub.f32 1.0, %v1614_v51 }
 0x139   :  { %v909_v60 = vmul.f32 %v2344_v52, %v3427_v10  ;;  %vm1619_vm10 = vweird.f32 %v2342_v15  ;;  %vm3489_vm11 = vcmp.eq.f32.partialorder %v917_v14, 8.507059e+37  ;;  %v920_v24 = vor.u32 1.1754944e-38, %v919_v39 }
 0x13a   :  { %2347 = vpow2.f32 %v2135_v3  ;;  %v1821_v61 = vpack.c.bf16 %v1757_v16, %v1757_v16  ;;  %v1381_v40 = vsel %vm1380_vm9, %v2338_v22, %v1377_v49  ;;  %v1616_v9 = vmul.f32 %v2342_v15, %v1615_v8  ;;  %vm1620_vm13 = vmor %vm1618_vm3, %vm1619_vm10 }
 0x13b   :  { %v910_v38 = vsub.f32 1.0, %v909_v60  ;;  %v1386_v36 = vsel %vm3453_vm2, %v1385_v31, %v1381_v40  ;;  %vm914_vm12 = vweird.f32 %v2344_v52  ;;  %v1157_v58 = vand.u32 2147483647, %v3464_v27 }
 0x13c   :  { %2349 = vpow2.f32 %v2151_v48  ;;  %1886 = vst.msk [vmem:[%s4089_s3 + $0x60] sm:$0xf] %vm1861_vm6, %v1821_v61  ;;  %v1773_v57 = vmul.f32 %v1386_v36, %v3342_v7  ;;  %v1617_v45 = vadd.f32 %v2342_v15, %v1616_v9  ;;  %v2104_v2 = vmul.f32 -1.442695, %v3478_v56  ;;  %vm915_vm14 = vmor %vm913_vm8, %vm914_vm12 }
 0x13d   :  { %v911_v33 = vmul.f32 %v2344_v52, %v910_v38  ;;  %v2346_v54 = vpop.eup %2345  ;;  %v1159_v1 = vand.u32 2147483648, %v3464_v27  ;;  %v3507_v50 = vadd.f32 %v3124_v30, %v422_v17  ;;  %v3510_v53 = vadd.f32 %v3124_v30, %v462_v46 }
 0x13e   :  { %v3513_v7 = vadd.f32 %v3124_v30, %v502_v0  ;;  %v1837_v4 = vpack.c.bf16 %v1773_v57, %v1773_v57  ;;  %v1621_v37 = vsel %vm1620_vm13, %v2342_v15, %v1617_v45  ;;  %v1149_v25 = vmul.f32 %v2346_v54, %v3464_v27 }
 0x13f   :  { %v912_v22 = vadd.f32 %v2344_v52, %v911_v33  ;;  %v1626_v59 = vsel %vm3468_vm7, %v1625_v44, %v1621_v37  ;;  %2351 = vpow2.f32 %v2104_v2  ;;  %v2120_v26 = vmul.f32 -1.442695, %v3507_v50 }
 0x140   :  { %v2348_v32 = vpop.eup %2347  ;;  %v3523_v29 = vadd.f32 %v3124_v30, %v384_v55  ;;  %1902 = vst.msk [vmem:[%s4089_s3 + $0xa0] sm:$0xf] %vm1861_vm6, %v1837_v4  ;;  %v1789_v23 = vmul.f32 %v1626_v59, %v3359_v18  ;;  %v1150_v47 = vsub.f32 1.0, %v1149_v25  ;;  %vm1154_vm15 = vweird.f32 %v2346_v54 }
 0x141   :  { %v916_v11 = vsel %vm915_vm14, %v2344_v52, %v912_v22  ;;  %v3530_v19 = vadd.f32 1.0, %v2348_v32  ;;  %2353 = vpow2.f32 %v2120_v26  ;;  %v2136_v31 = vmul.f32 -1.442695, %v3510_v53  ;;  %v424_v52 = vpop.f32.mrf.mxu1 }
 0x142   :  { %v2350_v20 = vpop.eup %2349  ;;  %v921_v10 = vsel %vm3489_vm11, %v920_v24, %v916_v11  ;;  %v1853_v14 = vpack.c.bf16 %v1789_v23, %v1789_v23  ;;  %v1151_v43 = vmul.f32 %v2346_v54, %v1150_v47  ;;  %v2152_v18 = vmul.f32 -1.442695, %v3513_v7  ;;  %v464_v24 = vpop.f32.mrf.mxu2 }
 0x143   :  { %v1742_v12 = vmul.f32 %v921_v10, %v3362_v5  ;;  %2355 = vrcp.f32 %v3530_v19  ;;  %v3537_v6 = vadd.f32 1.0, %v2350_v20  ;;  %vm1153_vm0 = vweird.f32 %v3464_v27 }
 0x144   :  { %1918 = vst.msk [vmem:[%s4089_s3 + $0xe0] sm:$0xf] %vm1861_vm6, %v1853_v14  ;;  %v1152_v15 = vadd.f32 %v2346_v54, %v1151_v43  ;;  %2357 = vpow2.f32 %v2136_v31  ;;  %vm1155_vm1 = vmor %vm1153_vm0, %vm1154_vm15  ;;  %v1160_v5 = vor.u32 1.1754944e-38, %v1159_v1  ;;  %v1397_v3 = vand.u32 2147483647, %v3530_v19 }
 0x145   :  { %v1806_v39 = vpack.c.bf16 %v1742_v12, %v1742_v12  ;;  %v2352_v44 = vpop.eup %2351  ;;  %v1399_v35 = vand.u32 2147483648, %v3530_v19  ;;  %2359 = vrcp.f32 %v3537_v6  ;;  %vm1158_vm2 = vcmp.eq.f32.partialorder %v1157_v58, 8.507059e+37 }
 0x146   :  { %v1156_v42 = vsel %vm1155_vm1, %v2346_v54, %v1152_v15  ;;  %v3553_v63 = vadd.f32 1.0, %v2352_v44  ;;  %v2105_v27 = vmul.f32 -1.442695, %v3523_v29  ;;  %2361 = vpow2.f32 %v2152_v18 }
 0x147   :  { %1871 = vst.msk [vmem:[%s4089_s3 + $0x24] sm:$0xf] %vm1861_vm6, %v1806_v39  ;;  %v2354_v51 = vpop.eup %2353  ;;  %v1161_v41 = vsel %vm1158_vm2, %v1160_v5, %v1156_v42  ;;  %vm1393_vm3 = vweird.f32 %v3530_v19  ;;  %v1637_v16 = vand.u32 2147483647, %v3537_v6  ;;  %vm3561_vm4 = vcmp.eq.f32.partialorder %v1397_v3, 8.507059e+37 }
 0x148   :  { %v1758_v48 = vmul.f32 %v1161_v41, %v3380_v34  ;;  %2363 = vrcp.f32 %v3553_v63  ;;  %v1400_v60 = vor.u32 1.1754944e-38, %v1399_v35  ;;  %v1639_v62 = vand.u32 2147483648, %v3537_v6 }
 0x149   :  { %v2356_v28 = vpop.eup %2355  ;;  %vm1633_vm5 = vweird.f32 %v3537_v6  ;;  %v3567_v34 = vadd.f32 1.0, %v2354_v51  ;;  %2365 = vpow2.f32 %v2105_v27  ;;  %v3570_v40 = vadd.f32 %v3124_v30, %v424_v52 }
 0x14a   :  { %v1389_v49 = vmul.f32 %v2356_v28, %v3530_v19  ;;  %v2358_v17 = vpop.eup %2357  ;;  %v1822_v61 = vpack.c.bf16 %v1758_v48, %v1758_v48  ;;  %v932_v46 = vand.u32 2147483647, %v3553_v63  ;;  %v934_v0 = vand.u32 2147483648, %v3553_v63  ;;  %v504_v48 = vpop.f32.mrf.mxu3 }
 0x14b   :  { %v2360_v9 = vpop.eup %2359  ;;  %v3574_v36 = vadd.f32 1.0, %v2358_v17  ;;  %vm3581_vm7 = vcmp.eq.f32.partialorder %v1637_v16, 8.507059e+37  ;;  %2367 = vrcp.f32 %v3567_v34  ;;  %v3587_v45 = vadd.f32 %v3124_v30, %v464_v24 }
 0x14c   :  { %v1390_v38 = vsub.f32 1.0, %v1389_v49  ;;  %1887 = vst.msk [vmem:[%s4089_s3 + $0x64] sm:$0xf] %vm1861_vm6, %v1822_v61  ;;  %v1629_v58 = vmul.f32 %v2360_v9, %v3537_v6  ;;  %v2362_v33 = vpop.eup %2361  ;;  %vm1394_vm8 = vweird.f32 %v2356_v28  ;;  %v1640_v55 = vor.u32 1.1754944e-38, %v1639_v62 }
 0x14d   :  { %vm928_vm9 = vweird.f32 %v3553_v63  ;;  %vm1634_vm10 = vweird.f32 %v2360_v9  ;;  %2369 = vrcp.f32 %v3574_v36  ;;  %v2121_v4 = vmul.f32 -1.442695, %v3570_v40  ;;  %vm1395_vm13 = vmor %vm1393_vm3, %vm1394_vm8 }
 0x14e   :  { %v1391_v2 = vmul.f32 %v2356_v28, %v1390_v38  ;;  %v2364_v54 = vpop.eup %2363  ;;  %v1630_v1 = vsub.f32 1.0, %v1629_v58  ;;  %vm3593_vm11 = vcmp.eq.f32.partialorder %v932_v46, 8.507059e+37  ;;  %v935_v30 = vor.u32 1.1754944e-38, %v934_v0  ;;  %vm1635_vm15 = vmor %vm1633_vm5, %vm1634_vm10 }
 0x14f   :  { %v924_v22 = vmul.f32 %v2364_v54, %v3553_v63  ;;  %vm1168_vm12 = vweird.f32 %v3567_v34  ;;  %v2366_v32 = vpop.eup %2365  ;;  %v1172_v26 = vand.u32 2147483647, %v3567_v34  ;;  %v1174_v23 = vand.u32 2147483648, %v3567_v34 }
 0x150   :  { %v1392_v37 = vadd.f32 %v2356_v28, %v1391_v2  ;;  %v1631_v59 = vmul.f32 %v2360_v9, %v1630_v1  ;;  %v1412_v11 = vand.u32 2147483647, %v3574_v36  ;;  %vm929_vm14 = vweird.f32 %v2364_v54 }
 0x151   :  { %v925_v20 = vsub.f32 1.0, %v924_v22  ;;  %v3603_v10 = vadd.f32 1.0, %v2362_v33  ;;  %v2368_v31 = vpop.eup %2367  ;;  %v1414_v19 = vand.u32 2147483648, %v3574_v36  ;;  %2371 = vpow2.f32 %v2121_v4  ;;  %vm930_vm2 = vmor %vm928_vm9, %vm929_vm14 }
 0x152   :  { %v1396_v47 = vsel %vm1395_vm13, %v2356_v28, %v1392_v37  ;;  %v1632_v12 = vadd.f32 %v2360_v9, %v1631_v59  ;;  %v1164_v39 = vmul.f32 %v2368_v31, %v3567_v34  ;;  %v3613_v15 = vadd.f32 1.0, %v2366_v32 }
 0x153   :  { %v1401_v14 = vsel %vm3561_vm4, %v1400_v60, %v1396_v47  ;;  %v926_v18 = vmul.f32 %v2364_v54, %v925_v20  ;;  %v2370_v44 = vpop.eup %2369  ;;  %vm3615_vm0 = vcmp.eq.f32.partialorder %v1172_v26, 8.507059e+37  ;;  %v1175_v35 = vor.u32 1.1754944e-38, %v1174_v23  ;;  %v467_v47 = vpop.f32.mrf.mxu2 }
 0x154   :  { %v1774_v43 = vmul.f32 %v1401_v14, %v3422_v21  ;;  %v1636_v5 = vsel %vm1635_vm15, %v2360_v9, %v1632_v12  ;;  %vm1408_vm1 = vweird.f32 %v3574_v36  ;;  %2373 = vrcp.f32 %v3603_v10  ;;  %v507_v12 = vpop.f32.mrf.mxu3 }
 0x155   :  { %v1641_v6 = vsel %vm3581_vm7, %v1640_v55, %v1636_v5  ;;  %v927_v42 = vadd.f32 %v2364_v54, %v926_v18  ;;  %v1165_v27 = vsub.f32 1.0, %v1164_v39  ;;  %vm1169_vm3 = vweird.f32 %v2368_v31  ;;  %v387_v55 = vpop.f32.mrf.mxu0  ;;  %v3689_v18 = vld [vmem:[%s4088_s2] ss:$0 sm:$0xff] }
 0x156   :  { %v1838_v21 = vpack.c.bf16 %v1774_v43, %v1774_v43  ;;  %v1790_v51 = vmul.f32 %v1641_v6, %v3431_v13  ;;  %v1404_v41 = vmul.f32 %v2370_v44, %v3574_v36  ;;  %vm3628_vm4 = vcmp.eq.f32.partialorder %v1412_v11, 8.507059e+37  ;;  %vm1170_vm8 = vmor %vm1168_vm12, %vm1169_vm3  ;;  %v427_v36 = vpop.f32.mrf.mxu1 }
 0x157   :  { %v1415_v28 = vor.u32 1.1754944e-38, %v1414_v19  ;;  %v931_v16 = vsel %vm930_vm2, %v2364_v54, %v927_v42  ;;  %v1166_v13 = vmul.f32 %v2368_v31, %v1165_v27  ;;  %v1652_v49 = vand.u32 2147483647, %v3603_v10  ;;  %v2372_v63 = vpop.eup %2371 }
 0x158   :  { %1903 = vst.msk [vmem:[%s4089_s3 + $0xa4] sm:$0xf] %vm1861_vm6, %v1838_v21  ;;  %2375 = vrcp.f32 %v3613_v15  ;;  %v1854_v8 = vpack.c.bf16 %v1790_v51, %v1790_v51  ;;  %v936_v60 = vsel %vm3593_vm11, %v935_v30, %v931_v16  ;;  %v1405_v62 = vsub.f32 1.0, %v1404_v41 }
 0x159   :  { %v1654_v24 = vand.u32 2147483648, %v3603_v10  ;;  %v1743_v17 = vmul.f32 %v936_v60, %v3478_v56  ;;  %v1167_v61 = vadd.f32 %v2368_v31, %v1166_v13  ;;  %vm1409_vm5 = vweird.f32 %v2370_v44 }
 0x15a   :  { %vm1648_vm7 = vweird.f32 %v3603_v10  ;;  %v2374_v9 = vpop.eup %2373  ;;  %1919 = vst.msk [vmem:[%s4089_s3 + $0xe4] sm:$0xf] %vm1861_vm6, %v1854_v8  ;;  %v1406_v38 = vmul.f32 %v2370_v44, %v1405_v62  ;;  %v947_v46 = vand.u32 2147483647, %v3613_v15  ;;  %v949_v0 = vand.u32 2147483648, %v3613_v15  ;;  %vm1410_vm11 = vmor %vm1408_vm1, %vm1409_vm5 }
 0x15b   :  { %v3652_v56 = vadd.f32 1.0, %v2372_v63  ;;  %v1807_v58 = vpack.c.bf16 %v1743_v17, %v1743_v17  ;;  %v1171_v57 = vsel %vm1170_vm8, %v2368_v31, %v1167_v61  ;;  %v1644_v33 = vmul.f32 %v2374_v9, %v3603_v10 }
 0x15c   :  { %vm3655_vm9 = vcmp.eq.f32.partialorder %v1652_v49, 8.507059e+37  ;;  %v1176_v34 = vsel %vm3615_vm0, %v1175_v35, %v1171_v57  ;;  %v1407_v54 = vadd.f32 %v2370_v44, %v1406_v38  ;;  %v1655_v1 = vor.u32 1.1754944e-38, %v1654_v24  ;;  %v469_v57 = vpop.f32.mrf.mxu2  ;;  %v509_v59 = vpop.f32.mrf.mxu3 }
 0x15d   :  { %vm943_vm10 = vweird.f32 %v3613_v15  ;;  %v2137_v4 = vmul.f32 -1.442695, %v3587_v45  ;;  %1872 = vst.msk [vmem:[%s4089_s3 + $0x28] sm:$0xf] %vm1861_vm6, %v1807_v58  ;;  %v1759_v22 = vmul.f32 %v1176_v34, %v3507_v50  ;;  %v1645_v25 = vsub.f32 1.0, %v1644_v33  ;;  %v389_v13 = vpop.f32.mrf.mxu0 }
 0x15e   :  { %v2376_v37 = vpop.eup %2375  ;;  %vm1649_vm12 = vweird.f32 %v2374_v9  ;;  %2377 = vrcp.f32 %v3652_v56  ;;  %v1411_v30 = vsel %vm1410_vm11, %v2370_v44, %v1407_v54  ;;  %vm3673_vm13 = vcmp.eq.f32.partialorder %v947_v46, 8.507059e+37  ;;  %v429_v46 = vpop.f32.mrf.mxu1 }
 0x15f   :  { %v939_v32 = vmul.f32 %v2376_v37, %v3613_v15  ;;  %v950_v26 = vor.u32 1.1754944e-38, %v949_v0  ;;  %v1823_v23 = vpack.c.bf16 %v1759_v22, %v1759_v22  ;;  %v1416_v50 = vsel %vm3628_vm4, %v1415_v28, %v1411_v30  ;;  %vm1650_vm15 = vmor %vm1648_vm7, %vm1649_vm12 }
 0x160   :  { %v1646_v11 = vmul.f32 %v2374_v9, %v1645_v25  ;;  %vm944_vm14 = vweird.f32 %v2376_v37  ;;  %v1775_v20 = vmul.f32 %v1416_v50, %v3510_v53  ;;  %v1187_v14 = vand.u32 2147483647, %v3652_v56 }
 0x161   :  { %v940_v31 = vsub.f32 1.0, %v939_v32  ;;  %2379 = vpow2.f32 %v2137_v4  ;;  %1888 = vst.msk [vmem:[%s4089_s3 + $0x68] sm:$0xf] %vm1861_vm6, %v1823_v23  ;;  %v1189_v43 = vand.u32 2147483648, %v3652_v56  ;;  %v3692_v53 = vadd.f32 %v3689_v18, %v504_v48  ;;  %vm945_vm1 = vmor %vm943_vm10, %vm944_vm14 }
 0x162   :  { %v1647_v19 = vadd.f32 %v2374_v9, %v1646_v11  ;;  %v3695_v39 = vadd.f32 %v3689_v18, %v387_v55  ;;  %v1839_v44 = vpack.c.bf16 %v1775_v20, %v1775_v20  ;;  %v3701_v3 = vadd.f32 %v3689_v18, %v427_v36 }
 0x163   :  { %v941_v5 = vmul.f32 %v2376_v37, %v940_v31  ;;  %v3704_v35 = vadd.f32 %v3689_v18, %v467_v47  ;;  %v2153_v42 = vmul.f32 -1.442695, %v3692_v53  ;;  %v3709_v51 = vadd.f32 %v3689_v18, %v507_v12 }
 0x164   :  { %v2378_v21 = vpop.eup %2377  ;;  %v1651_v6 = vsel %vm1650_vm15, %v2374_v9, %v1647_v19  ;;  %v2106_v27 = vmul.f32 -1.442695, %v3695_v39  ;;  %1904 = vst.msk [vmem:[%s4089_s3 + $0xa8] sm:$0xf] %vm1861_vm6, %v1839_v44  ;;  %v2122_v48 = vmul.f32 -1.442695, %v3701_v3  ;;  %v3731_v61 = vadd.f32 %v3689_v18, %v389_v13 }
 0x165   :  { %v1656_v10 = vsel %vm3655_vm9, %v1655_v1, %v1651_v6  ;;  %v942_v41 = vadd.f32 %v2376_v37, %v941_v5  ;;  %v1179_v52 = vmul.f32 %v2378_v21, %v3652_v56  ;;  %vm1184_vm0 = vweird.f32 %v2378_v21 }
 0x166   :  { %v1791_v28 = vmul.f32 %v1656_v10, %v3513_v7  ;;  %2381 = vpow2.f32 %v2153_v42  ;;  %v2138_v16 = vmul.f32 -1.442695, %v3704_v35  ;;  %v2154_v60 = vmul.f32 -1.442695, %v3709_v51 }
 0x167   :  { %v2380_v49 = vpop.eup %2379  ;;  %v946_v63 = vsel %vm945_vm1, %v2376_v37, %v942_v41  ;;  %v1180_v8 = vsub.f32 1.0, %v1179_v52  ;;  %2383 = vpow2.f32 %v2106_v27  ;;  %vm1183_vm2 = vweird.f32 %v3652_v56  ;;  %v392_v41 = vpop.f32.mrf.mxu0 }
 0x168   :  { %v1855_v62 = vpack.c.bf16 %v1791_v28, %v1791_v28  ;;  %v951_v7 = vsel %vm3673_vm13, %v950_v26, %v946_v63  ;;  %v3727_v24 = vadd.f32 1.0, %v2380_v49  ;;  %2385 = vpow2.f32 %v2122_v48  ;;  %vm1185_vm3 = vmor %vm1183_vm2, %vm1184_vm0 }
 0x169   :  { %v1744_v15 = vmul.f32 %v951_v7, %v3523_v29  ;;  %v1181_v17 = vmul.f32 %v2378_v21, %v1180_v8  ;;  %2387 = vpow2.f32 %v2138_v16  ;;  %vm1188_vm4 = vcmp.eq.f32.partialorder %v1187_v14, 8.507059e+37  ;;  %v472_v8 = vpop.f32.mrf.mxu2 }
 0x16a   :  { %1920 = vst.msk [vmem:[%s4089_s3 + $0xe8] sm:$0xf] %vm1861_vm6, %v1855_v62  ;;  %2389 = vrcp.f32 %v3727_v24  ;;  %v1190_v29 = vor.u32 1.1754944e-38, %v1189_v43  ;;  %v1427_v58 = vand.u32 2147483647, %v3727_v24  ;;  %v1429_v55 = vand.u32 2147483648, %v3727_v24 }
 0x16b   :  { %v1808_v9 = vpack.c.bf16 %v1744_v15, %v1744_v15  ;;  %v1182_v38 = vadd.f32 %v2378_v21, %v1181_v17  ;;  %2391 = vpow2.f32 %v2154_v60  ;;  %v2107_v34 = vmul.f32 -1.442695, %v3731_v61 }
 0x16c   :  { %v2382_v0 = vpop.eup %2381  ;;  %v3752_v37 = vadd.f32 %v3689_v18, %v429_v46  ;;  %v3757_v30 = vadd.f32 %v3689_v18, %v469_v57  ;;  %vm1423_vm5 = vweird.f32 %v3727_v24  ;;  %vm3762_vm7 = vcmp.eq.f32.partialorder %v1427_v58, 8.507059e+37 }
 0x16d   :  { %v2384_v33 = vpop.eup %2383  ;;  %1873 = vst.msk [vmem:[%s4089_s3 + $0x2c] sm:$0xf] %vm1861_vm6, %v1808_v9  ;;  %v1186_v2 = vsel %vm1185_vm3, %v2378_v21, %v1182_v38  ;;  %v3746_v56 = vadd.f32 1.0, %v2382_v0  ;;  %v3781_v43 = vadd.f32 %v3689_v18, %v509_v59 }
 0x16e   :  { %v2386_v54 = vpop.eup %2385  ;;  %v1191_v1 = vsel %vm1188_vm4, %v1190_v29, %v1186_v2  ;;  %v3749_v4 = vadd.f32 1.0, %v2384_v33  ;;  %v2123_v31 = vmul.f32 -1.442695, %v3752_v37  ;;  %v3778_v19 = vmul.f32 -1.442695, %v3757_v30 }
 0x16f   :  { %v2388_v22 = vpop.eup %2387  ;;  %v1760_v25 = vmul.f32 %v1191_v1, %v3570_v40  ;;  %2393 = vrcp.f32 %v3746_v56  ;;  %v1430_v40 = vor.u32 1.1754944e-38, %v1429_v55  ;;  %v1667_v36 = vand.u32 2147483647, %v3746_v56 }
 0x170   :  { %v2390_v32 = vpop.eup %2389  ;;  %2395 = vrcp.f32 %v3749_v4  ;;  %v1669_v47 = vand.u32 2147483648, %v3746_v56  ;;  %v3768_v20 = vadd.f32 1.0, %v2386_v54  ;;  %v3775_v12 = vadd.f32 1.0, %v2388_v22 }
 0x171   :  { %v2392_v26 = vpop.eup %2391  ;;  %v1824_v23 = vpack.c.bf16 %v1760_v25, %v1760_v25  ;;  %v1419_v50 = vmul.f32 %v2390_v32, %v3727_v24  ;;  %2397 = vpow2.f32 %v2107_v34  ;;  %vm1663_vm8 = vweird.f32 %v3746_v56 }
 0x172   :  { %v962_v44 = vand.u32 2147483647, %v3749_v4  ;;  %v964_v5 = vand.u32 2147483648, %v3749_v4  ;;  %2399 = vrcp.f32 %v3768_v20  ;;  %v3787_v21 = vadd.f32 1.0, %v2392_v26 }
 0x173   :  { %1889 = vst.msk [vmem:[%s4089_s3 + $0x6c] sm:$0xf] %vm1861_vm6, %v1824_v23  ;;  %v1420_v14 = vsub.f32 1.0, %v1419_v50  ;;  %vm1424_vm9 = vweird.f32 %v2390_v32  ;;  %vm958_vm10 = vweird.f32 %v3749_v4  ;;  %2401 = vrcp.f32 %v3775_v12 }
 0x174   :  { %vm3792_vm11 = vcmp.eq.f32.partialorder %v1667_v36, 8.507059e+37  ;;  %v1670_v52 = vor.u32 1.1754944e-38, %v1669_v47  ;;  %2403 = vpow2.f32 %v2123_v31  ;;  %v1202_v13 = vand.u32 2147483647, %v3768_v20  ;;  %vm1425_vm12 = vmor %vm1423_vm5, %vm1424_vm9 }
 0x175   :  { %v2394_v6 = vpop.eup %2393  ;;  %v1421_v42 = vmul.f32 %v2390_v32, %v1420_v14  ;;  %v1204_v49 = vand.u32 2147483648, %v3768_v20  ;;  %vm3801_vm13 = vcmp.eq.f32.partialorder %v962_v44, 8.507059e+37  ;;  %v965_v60 = vor.u32 1.1754944e-38, %v964_v5 }
 0x176   :  { %v2396_v27 = vpop.eup %2395  ;;  %v1659_v10 = vmul.f32 %v2394_v6, %v3746_v56  ;;  %2405 = vrcp.f32 %v3787_v21  ;;  %vm1664_vm14 = vweird.f32 %v2394_v6  ;;  %vm1198_vm15 = vweird.f32 %v3768_v20 }
 0x177   :  { %v2398_v28 = vpop.eup %2397  ;;  %v1422_v48 = vadd.f32 %v2390_v32, %v1421_v42  ;;  %v954_v16 = vmul.f32 %v2396_v27, %v3749_v4  ;;  %vm959_vm0 = vweird.f32 %v2396_v27  ;;  %vm1438_vm1 = vweird.f32 %v3775_v12  ;;  %vm1665_vm3 = vmor %vm1663_vm8, %vm1664_vm14 }
 0x178   :  { %v1660_v63 = vsub.f32 1.0, %v1659_v10  ;;  %v2400_v15 = vpop.eup %2399  ;;  %v1442_v24 = vand.u32 2147483647, %v3775_v12  ;;  %vm3813_vm2 = vcmp.eq.f32.partialorder %v1202_v13, 8.507059e+37  ;;  %v1205_v57 = vor.u32 1.1754944e-38, %v1204_v49  ;;  %vm960_vm5 = vmor %vm958_vm10, %vm959_vm0 }
 0x179   :  { %v1426_v62 = vsel %vm1425_vm12, %v2390_v32, %v1422_v48  ;;  %v955_v7 = vsub.f32 1.0, %v954_v16  ;;  %v2402_v38 = vpop.eup %2401  ;;  %v1194_v29 = vmul.f32 %v2400_v15, %v3768_v20  ;;  %v1444_v34 = vand.u32 2147483648, %v3775_v12 }
 0x17a   :  { %v1431_v17 = vsel %vm3762_vm7, %v1430_v40, %v1426_v62  ;;  %v1661_v9 = vmul.f32 %v2394_v6, %v1660_v63  ;;  %v2404_v33 = vpop.eup %2403  ;;  %v1434_v55 = vmul.f32 %v2402_v38, %v3775_v12  ;;  %v1682_v54 = vand.u32 2147483647, %v3787_v21  ;;  %v432_v63 = vpop.f32.mrf.mxu1 }
 0x17b   :  { %v1776_v46 = vmul.f32 %v1431_v17, %v3587_v45  ;;  %v956_v0 = vmul.f32 %v2396_v27, %v955_v7  ;;  %v1195_v22 = vsub.f32 1.0, %v1194_v29  ;;  %vm1199_vm4 = vweird.f32 %v2400_v15 }
 0x17c   :  { %v1662_v2 = vadd.f32 %v2394_v6, %v1661_v9  ;;  %v2406_v25 = vpop.eup %2405  ;;  %v1435_v59 = vsub.f32 1.0, %v1434_v55  ;;  %vm1439_vm7 = vweird.f32 %v2402_v38  ;;  %v3826_v26 = vadd.f32 1.0, %v2398_v28  ;;  %vm1200_vm8 = vmor %vm1198_vm15, %vm1199_vm4 }
 0x17d   :  { %v1840_v1 = vpack.c.bf16 %v1776_v46, %v1776_v46  ;;  %v957_v45 = vadd.f32 %v2396_v27, %v956_v0  ;;  %v1196_v50 = vmul.f32 %v2400_v15, %v1195_v22  ;;  %v1674_v11 = vmul.f32 %v2406_v25, %v3787_v21  ;;  %vm1440_vm9 = vmor %vm1438_vm1, %vm1439_vm7 }
 0x17e   :  { %v1666_v32 = vsel %vm1665_vm3, %v2394_v6, %v1662_v2  ;;  %v1436_v36 = vmul.f32 %v2402_v38, %v1435_v59  ;;  %v3838_v47 = vadd.f32 1.0, %v2404_v33  ;;  %2407 = vrcp.f32 %v3826_v26 }
 0x17f   :  { %1905 = vst.msk [vmem:[%s4089_s3 + $0xac] sm:$0xf] %vm1861_vm6, %v1840_v1  ;;  %v1671_v56 = vsel %vm3792_vm11, %v1670_v52, %v1666_v32  ;;  %v961_v23 = vsel %vm960_vm5, %v2396_v27, %v957_v45  ;;  %v1197_v14 = vadd.f32 %v2400_v15, %v1196_v50  ;;  %v1675_v44 = vsub.f32 1.0, %v1674_v11 }
 0x180   :  { %v1792_v40 = vmul.f32 %v1671_v56, %v3692_v53  ;;  %v966_v4 = vsel %vm3801_vm13, %v965_v60, %v961_v23  ;;  %v1437_v6 = vadd.f32 %v2402_v38, %v1436_v36  ;;  %v1445_v42 = vor.u32 1.1754944e-38, %v1444_v34 }
 0x181   :  { %v1745_v31 = vmul.f32 %v966_v4, %v3695_v39  ;;  %v1684_v53 = vand.u32 2147483648, %v3787_v21  ;;  %v1201_v10 = vsel %vm1200_vm8, %v2400_v15, %v1197_v14  ;;  %v1676_v39 = vmul.f32 %v2406_v25, %v1675_v44 }
 0x182   :  { %v1856_v5 = vpack.c.bf16 %v1792_v40, %v1792_v40  ;;  %vm1679_vm10 = vweird.f32 %v2406_v25  ;;  %v1206_v20 = vsel %vm3813_vm2, %v1205_v57, %v1201_v10  ;;  %v1441_v52 = vsel %vm1440_vm9, %v2402_v38, %v1437_v6  ;;  %v434_v36 = vpop.f32.mrf.mxu1 }
 0x183   :  { %v1809_v27 = vpack.c.bf16 %v1745_v31, %v1745_v31  ;;  %vm1443_vm11 = vcmp.eq.f32.partialorder %v1442_v24, 8.507059e+37  ;;  %2409 = vrcp.f32 %v3838_v47  ;;  %v1761_v12 = vmul.f32 %v1206_v20, %v3701_v3  ;;  %v474_v31 = vpop.f32.mrf.mxu2 }
 0x184   :  { %1921 = vst.msk [vmem:[%s4089_s3 + $0xec] sm:$0xf] %vm1861_vm6, %v1856_v5  ;;  %v1446_v28 = vsel %vm1443_vm11, %v1445_v42, %v1441_v52  ;;  %v1677_v48 = vadd.f32 %v2406_v25, %v1676_v39  ;;  %vm1678_vm12 = vweird.f32 %v3787_v21  ;;  %vm1683_vm14 = vcmp.eq.f32.partialorder %v1682_v54, 8.507059e+37  ;;  %v2408_v60 = vpop.eup %2407 }
 0x185   :  { %1874 = vst.msk [vmem:[%s4089_s3 + $0x30] sm:$0xf] %vm1861_vm6, %v1809_v27  ;;  %v1777_v16 = vmul.f32 %v1446_v28, %v3704_v35  ;;  %vm1680_vm13 = vmor %vm1678_vm12, %vm1679_vm10  ;;  %v1685_v13 = vor.u32 1.1754944e-38, %v1684_v53  ;;  %v977_v49 = vand.u32 2147483647, %v3826_v26  ;;  %v1825_v62 = vpack.c.bf16 %v1761_v12, %v1761_v12 }
 0x186   :  { %v1681_v7 = vsel %vm1680_vm13, %v2406_v25, %v1677_v48  ;;  %2411 = vpow2.f32 %v3778_v19  ;;  %v2155_v3 = vmul.f32 -1.442695, %v3781_v43  ;;  %v969_v21 = vmul.f32 %v2408_v60, %v3826_v26  ;;  %v394_v25 = vpop.f32.mrf.mxu0 }
 0x187   :  { %v1841_v15 = vpack.c.bf16 %v1777_v16, %v1777_v16  ;;  %v1686_v17 = vsel %vm1683_vm14, %v1685_v13, %v1681_v7  ;;  %1890 = vst.msk [vmem:[%s4089_s3 + $0x70] sm:$0xf] %vm1861_vm6, %v1825_v62  ;;  %vm973_vm15 = vweird.f32 %v3826_v26  ;;  %v3878_v24 = vadd.f32 %v3689_v18, %v392_v41 }
 0x188   :  { %v1793_v35 = vmul.f32 %v1686_v17, %v3709_v51  ;;  %2413 = vpow2.f32 %v2155_v3  ;;  %v970_v19 = vsub.f32 1.0, %v969_v21  ;;  %v3881_v38 = vadd.f32 %v3689_v18, %v432_v63  ;;  %v512_v51 = vpop.f32.mrf.mxu3 }
 0x189   :  { %v2410_v9 = vpop.eup %2409  ;;  %1906 = vst.msk [vmem:[%s4089_s3 + $0xb0] sm:$0xf] %vm1861_vm6, %v1841_v15  ;;  %v3884_v46 = vadd.f32 %v3689_v18, %v472_v8  ;;  %vm3886_vm0 = vcmp.eq.f32.partialorder %v977_v49, 8.507059e+37  ;;  %v979_v58 = vand.u32 2147483648, %v3826_v26  ;;  %vm974_vm1 = vweird.f32 %v2408_v60 }
 0x18a   :  { %v1857_v0 = vpack.c.bf16 %v1793_v35, %v1793_v35  ;;  %v1209_v57 = vmul.f32 %v2410_v9, %v3838_v47  ;;  %v971_v33 = vmul.f32 %v2408_v60, %v970_v19  ;;  %v2108_v2 = vmul.f32 -1.442695, %v3878_v24  ;;  %vm975_vm2 = vmor %vm973_vm15, %vm974_vm1 }
 0x18b   :  { %v2124_v55 = vmul.f32 -1.442695, %v3881_v38  ;;  %v1217_v1 = vand.u32 2147483647, %v3838_v47  ;;  %v1219_v45 = vand.u32 2147483648, %v3838_v47  ;;  %v3901_v22 = vadd.f32 %v3689_v18, %v512_v51 }
 0x18c   :  { %v2412_v34 = vpop.eup %2411  ;;  %1922 = vst.msk [vmem:[%s4089_s3 + $0xf0] sm:$0xf] %vm1861_vm6, %v1857_v0  ;;  %v1210_v54 = vsub.f32 1.0, %v1209_v57  ;;  %v972_v32 = vadd.f32 %v2408_v60, %v971_v33  ;;  %2415 = vpow2.f32 %v2108_v2  ;;  %v2140_v56 = vmul.f32 -1.442695, %v3884_v46 }
 0x18d   :  { %v3903_v59 = vadd.f32 1.0, %v2412_v34  ;;  %v980_v50 = vor.u32 1.1754944e-38, %v979_v58  ;;  %vm1214_vm3 = vweird.f32 %v2410_v9  ;;  %2417 = vpow2.f32 %v2124_v55 }
 0x18e   :  { %v2414_v23 = vpop.eup %2413  ;;  %v1211_v11 = vmul.f32 %v2410_v9, %v1210_v54  ;;  %v976_v40 = vsel %vm975_vm2, %v2408_v60, %v972_v32  ;;  %vm1213_vm4 = vweird.f32 %v3838_v47  ;;  %v3912_v4 = vadd.f32 %v3689_v18, %v394_v25 }
 0x18f   :  { %2419 = vrcp.f32 %v3903_v59  ;;  %v981_v14 = vsel %vm3886_vm0, %v980_v50, %v976_v40  ;;  %v3916_v26 = vadd.f32 1.0, %v2414_v23  ;;  %v2156_v5 = vmul.f32 -1.442695, %v3901_v22  ;;  %vm1215_vm5 = vmor %vm1213_vm4, %vm1214_vm3 }
 0x190   :  { %v1212_v44 = vadd.f32 %v2410_v9, %v1211_v11  ;;  %v1746_v6 = vmul.f32 %v981_v14, %v3731_v61  ;;  %vm1218_vm7 = vcmp.eq.f32.partialorder %v1217_v1, 8.507059e+37  ;;  %v1220_v47 = vor.u32 1.1754944e-38, %v1219_v45  ;;  %v514_v60 = vpop.f32.mrf.mxu3 }
 0x191   :  { %2421 = vpow2.f32 %v2140_v56  ;;  %v3922_v53 = vadd.f32 %v3689_v18, %v434_v36  ;;  %v3925_v27 = vadd.f32 %v3689_v18, %v474_v31  ;;  %v1457_v20 = vand.u32 2147483647, %v3903_v59 }
 0x192   :  { %v1216_v42 = vsel %vm1215_vm5, %v2410_v9, %v1212_v44  ;;  %2423 = vrcp.f32 %v3916_v26  ;;  %v2416_v10 = vpop.eup %2415  ;;  %v1810_v39 = vpack.c.bf16 %v1746_v6, %v1746_v6  ;;  %v2109_v61 = vmul.f32 -1.442695, %v3912_v4 }
 0x193   :  { %v1221_v41 = vsel %vm1218_vm7, %v1220_v47, %v1216_v42  ;;  %v2418_v52 = vpop.eup %2417  ;;  %v1459_v28 = vand.u32 2147483648, %v3903_v59  ;;  %v3931_v48 = vadd.f32 1.0, %v2416_v10  ;;  %2425 = vpow2.f32 %v2156_v5 }
 0x194   :  { %v1762_v12 = vmul.f32 %v1221_v41, %v3752_v37  ;;  %1875 = vst.msk [vmem:[%s4089_s3 + $0x34] sm:$0xf] %vm1861_vm6, %v1810_v39  ;;  %v1697_v13 = vand.u32 2147483647, %v3916_v26  ;;  %v3938_v49 = vadd.f32 1.0, %v2418_v52  ;;  %vm1453_vm8 = vweird.f32 %v3903_v59 }
 0x195   :  { %v2420_v16 = vpop.eup %2419  ;;  %2427 = vrcp.f32 %v3931_v48  ;;  %v2125_v37 = vmul.f32 -1.442695, %v3922_v53  ;;  %vm3944_vm9 = vcmp.eq.f32.partialorder %v1457_v20, 8.507059e+37  ;;  %v1699_v3 = vand.u32 2147483648, %v3916_v26 }
 0x196   :  { %v1826_v63 = vpack.c.bf16 %v1762_v12, %v1762_v12  ;;  %v1449_v8 = vmul.f32 %v2420_v16, %v3903_v59  ;;  %2429 = vrcp.f32 %v3938_v49  ;;  %v1460_v21 = vor.u32 1.1754944e-38, %v1459_v28 }
 0x197   :  { %v2422_v62 = vpop.eup %2421  ;;  %vm1693_vm10 = vweird.f32 %v3916_v26  ;;  %v3956_v35 = vmul.f32 -1.442695, %v3925_v27  ;;  %vm3959_vm11 = vcmp.eq.f32.partialorder %v1697_v13, 8.507059e+37  ;;  %2431 = vpow2.f32 %v2109_v61 }
 0x198   :  { %v2424_v15 = vpop.eup %2423  ;;  %1891 = vst.msk [vmem:[%s4089_s3 + $0x74] sm:$0xf] %vm1861_vm6, %v1826_v63  ;;  %v1450_v17 = vsub.f32 1.0, %v1449_v8  ;;  %v3964_v51 = vadd.f32 %v3689_v18, %v514_v60  ;;  %vm1454_vm12 = vweird.f32 %v2420_v16  ;;  %v992_v58 = vand.u32 2147483647, %v3931_v48 }
 0x199   :  { %v1689_v9 = vmul.f32 %v2424_v15, %v3916_v26  ;;  %v2426_v0 = vpop.eup %2425  ;;  %v3967_v57 = vadd.f32 1.0, %v2422_v62  ;;  %v1700_v2 = vor.u32 1.1754944e-38, %v1699_v3  ;;  %vm988_vm13 = vweird.f32 %v3931_v48  ;;  %vm1455_vm15 = vmor %vm1453_vm8, %vm1454_vm12 }
 0x19a   :  { %v1451_v29 = vmul.f32 %v2420_v16, %v1450_v17  ;;  %v994_v55 = vand.u32 2147483648, %v3931_v48  ;;  %vm1228_vm14 = vweird.f32 %v3938_v49  ;;  %v3973_v18 = vadd.f32 1.0, %v2426_v0 }
 0x19b   :  { %v1690_v33 = vsub.f32 1.0, %v1689_v9  ;;  %v2428_v34 = vpop.eup %2427  ;;  %2433 = vrcp.f32 %v3967_v57  ;;  %vm1694_vm0 = vweird.f32 %v2424_v15  ;;  %v1232_v32 = vand.u32 2147483647, %v3938_v49 }
 0x19c   :  { %v1452_v54 = vadd.f32 %v2420_v16, %v1451_v29  ;;  %v2430_v1 = vpop.eup %2429  ;;  %v984_v25 = vmul.f32 %v2428_v34, %v3931_v48  ;;  %vm3979_vm1 = vcmp.eq.f32.partialorder %v992_v58, 8.507059e+37  ;;  %v1234_v11 = vand.u32 2147483648, %v3938_v49  ;;  %vm1695_vm2 = vmor %vm1693_vm10, %vm1694_vm0 }
 0x19d   :  { %v1691_v45 = vmul.f32 %v2424_v15, %v1690_v33  ;;  %v1224_v50 = vmul.f32 %v2430_v1, %v3938_v49  ;;  %v2432_v40 = vpop.eup %2431  ;;  %2435 = vpow2.f32 %v2125_v37  ;;  %v995_v44 = vor.u32 1.1754944e-38, %v994_v55 }
 0x19e   :  { %v1456_v56 = vsel %vm1455_vm15, %v2420_v16, %v1452_v54  ;;  %v985_v31 = vsub.f32 1.0, %v984_v25  ;;  %2437 = vrcp.f32 %v3973_v18  ;;  %vm989_vm3 = vweird.f32 %v2428_v34 }
 0x19f   :  { %v1461_v59 = vsel %vm3944_vm9, %v1460_v21, %v1456_v56  ;;  %v1692_v36 = vadd.f32 %v2424_v15, %v1691_v45  ;;  %v1225_v5 = vsub.f32 1.0, %v1224_v50  ;;  %vm1229_vm4 = vweird.f32 %v2430_v1  ;;  %vm990_vm7 = vmor %vm988_vm13, %vm989_vm3 }
 0x1a0   :  { %v1778_v14 = vmul.f32 %v1461_v59, %v3757_v30  ;;  %v986_v47 = vmul.f32 %v2428_v34, %v985_v31  ;;  %v3993_v20 = vadd.f32 1.0, %v2432_v40  ;;  %vm3996_vm5 = vcmp.eq.f32.partialorder %v1232_v32, 8.507059e+37  ;;  %vm1230_vm8 = vmor %vm1228_vm14, %vm1229_vm4 }
 0x1a1   :  { %v1696_v6 = vsel %vm1695_vm2, %v2424_v15, %v1692_v36  ;;  %v2434_v42 = vpop.eup %2433  ;;  %v1226_v41 = vmul.f32 %v2430_v1, %v1225_v5  ;;  %v1235_v28 = vor.u32 1.1754944e-38, %v1234_v11  ;;  %v1472_v16 = vand.u32 2147483647, %v3967_v57 }
 0x1a2   :  { %v1842_v10 = vpack.c.bf16 %v1778_v14, %v1778_v14  ;;  %v1701_v39 = vsel %vm3959_vm11, %v1700_v2, %v1696_v6  ;;  %v987_v26 = vadd.f32 %v2428_v34, %v986_v47  ;;  %v1464_v52 = vmul.f32 %v2434_v42, %v3967_v57 }
 0x1a3   :  { %v1794_v30 = vmul.f32 %v1701_v39, %v3781_v43  ;;  %v1227_v12 = vadd.f32 %v2430_v1, %v1226_v41  ;;  %2439 = vrcp.f32 %v3993_v20  ;;  %v2436_v43 = vpop.eup %2435  ;;  %v2157_v37 = vmul.f32 -1.442695, %v3964_v51 }
 0x1a4   :  { %1907 = vst.msk [vmem:[%s4089_s3 + $0xb4] sm:$0xf] %vm1861_vm6, %v1842_v10  ;;  %v991_v63 = vsel %vm990_vm7, %v2428_v34, %v987_v26  ;;  %v1465_v8 = vsub.f32 1.0, %v1464_v52  ;;  %v2438_v60 = vpop.eup %2437  ;;  %vm1469_vm9 = vweird.f32 %v2434_v42  ;;  %v1474_v7 = vand.u32 2147483648, %v3967_v57 }
 0x1a5   :  { %v1858_v13 = vpack.c.bf16 %v1794_v30, %v1794_v30  ;;  %v996_v48 = vsel %vm3979_vm1, %v995_v44, %v991_v63  ;;  %v1231_v62 = vsel %vm1230_vm8, %v2430_v1, %v1227_v12  ;;  %v1704_v17 = vmul.f32 %v2438_v60, %v3973_v18 }
 0x1a6   :  { %v1747_v3 = vmul.f32 %v996_v48, %v3878_v24  ;;  %v1236_v49 = vsel %vm3996_vm5, %v1235_v28, %v1231_v62  ;;  %v1466_v15 = vmul.f32 %v2434_v42, %v1465_v8  ;;  %vm1468_vm10 = vweird.f32 %v3967_v57 }
 0x1a7   :  { %1923 = vst.msk [vmem:[%s4089_s3 + $0xf4] sm:$0xf] %vm1861_vm6, %v1858_v13  ;;  %v1763_v21 = vmul.f32 %v1236_v49, %v3881_v38  ;;  %vm4026_vm11 = vcmp.eq.f32.partialorder %v1472_v16, 8.507059e+37  ;;  %v1712_v19 = vand.u32 2147483647, %v3973_v18  ;;  %v1705_v58 = vsub.f32 1.0, %v1704_v17  ;;  %vm1470_vm12 = vmor %vm1468_vm10, %vm1469_vm9 }
 0x1a8   :  { %v1811_v0 = vpack.c.bf16 %v1747_v3, %v1747_v3  ;;  %v1467_v29 = vadd.f32 %v2434_v42, %v1466_v15  ;;  %v4031_v24 = vadd.f32 1.0, %v2436_v43  ;;  %v1475_v55 = vor.u32 1.1754944e-38, %v1474_v7 }
 0x1a9   :  { %v2440_v33 = vpop.eup %2439  ;;  %v1827_v2 = vpack.c.bf16 %v1763_v21, %v1763_v21  ;;  %v1714_v38 = vand.u32 2147483648, %v3973_v18  ;;  %2441 = vpow2.f32 %v3956_v35  ;;  %v1706_v34 = vmul.f32 %v2438_v60, %v1705_v58 }
 0x1aa   :  { %1876 = vst.msk [vmem:[%s4089_s3 + $0x38] sm:$0xf] %vm1861_vm6, %v1811_v0  ;;  %v1471_v57 = vsel %vm1470_vm12, %v2434_v42, %v1467_v29  ;;  %vm1709_vm13 = vweird.f32 %v2438_v60  ;;  %v999_v54 = vmul.f32 %v2440_v33, %v3993_v20  ;;  %vm1708_vm14 = vweird.f32 %v3973_v18 }
 0x1ab   :  { %1892 = vst.msk [vmem:[%s4089_s3 + $0x78] sm:$0xf] %vm1861_vm6, %v1827_v2  ;;  %v1476_v1 = vsel %vm4026_vm11, %v1475_v55, %v1471_v57  ;;  %2443 = vrcp.f32 %v4031_v24  ;;  %v1707_v45 = vadd.f32 %v2438_v60, %v1706_v34  ;;  %vm1713_vm15 = vcmp.eq.f32.partialorder %v1712_v19, 8.507059e+37  ;;  %vm1710_vm0 = vmor %vm1708_vm14, %vm1709_vm13 }
 0x1ac   :  { %v1779_v35 = vmul.f32 %v1476_v1, %v3884_v46  ;;  %v1000_v25 = vsub.f32 1.0, %v999_v54  ;;  %v1715_v32 = vor.u32 1.1754944e-38, %v1714_v38  ;;  %v1007_v56 = vand.u32 2147483647, %v3993_v20 }
 0x1ad   :  { %v1009_v23 = vand.u32 2147483648, %v3993_v20  ;;  %2445 = vpow2.f32 %v2157_v37  ;;  %v1711_v11 = vsel %vm1710_vm0, %v2438_v60, %v1707_v45  ;;  %vm1004_vm1 = vweird.f32 %v2440_v33 }
 0x1ae   :  { %v1843_v50 = vpack.c.bf16 %v1779_v35, %v1779_v35  ;;  %v1001_v40 = vmul.f32 %v2440_v33, %v1000_v25  ;;  %v1716_v18 = vsel %vm1713_vm15, %v1715_v32, %v1711_v11  ;;  %vm1003_vm2 = vweird.f32 %v3993_v20 }
 0x1af   :  { %v2442_v59 = vpop.eup %2441  ;;  %v1795_v46 = vmul.f32 %v1716_v18, %v3901_v22  ;;  %vm1005_vm3 = vmor %vm1003_vm2, %vm1004_vm1  ;;  %v1010_v44 = vor.u32 1.1754944e-38, %v1009_v23  ;;  %vm1008_vm4 = vcmp.eq.f32.partialorder %v1007_v56, 8.507059e+37  ;;  %v1247_v20 = vand.u32 2147483647, %v4031_v24 }
 0x1b0   :  { %1908 = vst.msk [vmem:[%s4089_s3 + $0xb8] sm:$0xf] %vm1861_vm6, %v1843_v50  ;;  %v1002_v36 = vadd.f32 %v2440_v33, %v1001_v40  ;;  %v756_v31 = vadd.f32 1.0, %v2442_v59  ;;  %v1249_v30 = vand.u32 2147483648, %v4031_v24  ;;  %vm1243_vm7 = vweird.f32 %v4031_v24 }
 0x1b1   :  { %v2444_v14 = vpop.eup %2443  ;;  %v1859_v5 = vpack.c.bf16 %v1795_v46, %v1795_v46  ;;  %vm1248_vm9 = vcmp.eq.f32.partialorder %v1247_v20, 8.507059e+37 }
 0x1b2   :  { %v1006_v6 = vsel %vm1005_vm3, %v2440_v33, %v1002_v36  ;;  %v1239_v47 = vmul.f32 %v2444_v14, %v4031_v24  ;;  %2447 = vrcp.f32 %v756_v31  ;;  %vm1244_vm5 = vweird.f32 %v2444_v14 }
 0x1b3   :  { %v2446_v42 = vpop.eup %2445  ;;  %v1011_v10 = vsel %vm1008_vm4, %v1010_v44, %v1006_v6  ;;  %1924 = vst.msk [vmem:[%s4089_s3 + $0xf8] sm:$0xf] %vm1861_vm6, %v1859_v5  ;;  %vm1245_vm8 = vmor %vm1243_vm7, %vm1244_vm5  ;;  %v1489_v37 = vand.u32 2147483648, %v756_v31  ;;  %v1487_v7 = vand.u32 2147483647, %v756_v31  ;;  %vm1483_vm11 = vweird.f32 %v756_v31 }
 0x1b4   :  { %v1748_v22 = vmul.f32 %v1011_v10, %v3912_v4  ;;  %v1240_v39 = vsub.f32 1.0, %v1239_v47  ;;  %v772_v41 = vadd.f32 1.0, %v2446_v42  ;;  %v1250_v4 = vor.u32 1.1754944e-38, %v1249_v30 }
 0x1b5   :  { %v1490_v17 = vor.u32 1.1754944e-38, %v1489_v37  ;;  %vm1488_vm14 = vcmp.eq.f32.partialorder %v1487_v7, 8.507059e+37 }
 0x1b6   :  { %v1812_v26 = vpack.c.bf16 %v1748_v22, %v1748_v22  ;;  %v1241_v61 = vmul.f32 %v2444_v14, %v1240_v39  ;;  %2449 = vrcp.f32 %v772_v41  ;;  %v1729_v15 = vand.u32 2147483648, %v772_v41 }
 0x1b7   :  { %vm1723_vm15 = vweird.f32 %v772_v41 }
 0x1b8   :  { %1877 = vst.msk [vmem:[%s4089_s3 + $0x3c] sm:$0xf] %vm1861_vm6, %v1812_v26  ;;  %v1242_v52 = vadd.f32 %v2444_v14, %v1241_v61  ;;  %v2448_v12 = vpop.eup %2447  ;;  %v1730_v58 = vor.u32 1.1754944e-38, %v1729_v15 }
 0x1b9   :  { %v1479_v16 = vmul.f32 %v2448_v12, %v756_v31  ;;  %vm1484_vm10 = vweird.f32 %v2448_v12 }
 0x1ba   :  { %v1246_v28 = vsel %vm1245_vm8, %v2444_v14, %v1242_v52  ;;  %vm1485_vm12 = vmor %vm1483_vm11, %vm1484_vm10 }
 0x1bb   :  { %v1251_v43 = vsel %vm1248_vm9, %v1250_v4, %v1246_v28  ;;  %v1480_v8 = vsub.f32 1.0, %v1479_v16 }
 0x1bc   :  { %v2450_v13 = vpop.eup %2449  ;;  %v1764_v63 = vmul.f32 %v1251_v43, %v3922_v53  ;;  %v1727_v53 = vand.u32 2147483647, %v772_v41 }
 0x1bd   :  { %v1719_v60 = vmul.f32 %v2450_v13, %v772_v41  ;;  %v1481_v62 = vmul.f32 %v2448_v12, %v1480_v8  ;;  %vm1724_vm13 = vweird.f32 %v2450_v13 }
 0x1be   :  { %v1828_v48 = vpack.c.bf16 %v1764_v63, %v1764_v63  ;;  %vm1725_vm0 = vmor %vm1723_vm15, %vm1724_vm13  ;;  %vm1728_vm1 = vcmp.eq.f32.partialorder %v1727_v53, 8.507059e+37 }
 0x1bf   :  { %v1720_v3 = vsub.f32 1.0, %v1719_v60  ;;  %v1482_v49 = vadd.f32 %v2448_v12, %v1481_v62 }
 0x1c0   :  { %1893 = vst.msk [vmem:[%s4089_s3 + $0x7c] sm:$0xf] %vm1861_vm6, %v1828_v48 }
 0x1c1   :  { %v1721_v21 = vmul.f32 %v2450_v13, %v1720_v3  ;;  %v1486_v9 = vsel %vm1485_vm12, %v2448_v12, %v1482_v49 }
 0x1c2   :  { %v1491_v19 = vsel %vm1488_vm14, %v1490_v17, %v1486_v9 }
 0x1c3   :  { %v1722_v0 = vadd.f32 %v2450_v13, %v1721_v21  ;;  %v1780_v29 = vmul.f32 %v1491_v19, %v3925_v27 }
 0x1c5   :  { %v1726_v24 = vsel %vm1725_vm0, %v2450_v13, %v1722_v0  ;;  %v1844_v33 = vpack.c.bf16 %v1780_v29, %v1780_v29 }
 0x1c6   :  { %v1731_v2 = vsel %vm1728_vm1, %v1730_v58, %v1726_v24 }
 0x1c7   :  { %v1796_v55 = vmul.f32 %v1731_v2, %v3964_v51  ;;  %1909 = vst.msk [vmem:[%s4089_s3 + $0xbc] sm:$0xf] %vm1861_vm6, %v1844_v33 }
 0x1c9   :  { %v1860_v38 = vpack.c.bf16 %v1796_v55, %v1796_v55 }
 0x1cb   :  { %1925 = vst.msk [vmem:[%s4089_s3 + $0xfc] sm:$0xf] %vm1861_vm6, %v1860_v38 }

</bundles_post_ra>
